<compile_context>
chip_gen: v7x
topology: tpu7x:2x2x1
jax: 0.10.0
libtpu: 0.0.40
codegen_flags: <defaults>
</compile_context>

<pallas_src>
import functools

import jax
import jax.numpy as jnp
from jax.experimental import pallas as pl
from jax.experimental.pallas import tpu as pltpu

LANE = 128                       # lane width; output-channel padding target
TILE_M = 512                     # row tile for matmul grids (multiple of 8)
VMEM_LIMIT = 32 * 1024 * 1024    # safe on v5e/v6e/v7x


def _round_up(x, m):
    return ((x + m - 1) // m) * m


# ----------------------------------------------------------------------------
# Pallas kernels
# ----------------------------------------------------------------------------
def _mm_kernel(x_ref, w_ref, b_ref, o_ref, *, relu_out):
    """One (tm, K) x (K, N) tile: o = [relu](x @ w + b), stored in o_ref.dtype."""
    acc = jnp.dot(x_ref[...], w_ref[...], preferred_element_type=jnp.float32)
    acc = acc + b_ref[...]
    if relu_out:
        acc = jnp.maximum(acc, 0.0)
    o_ref[...] = acc.astype(o_ref.dtype)


def _resblock_kernel(p_ref, w1_ref, b1_ref, w2_ref, b2_ref, x_ref, o_ref, *,
                     relu_out):
    """Fused ResBlock tile: o = [relu](x + conv1x1(relu(conv3x3_patches @ w1)))."""
    t = jnp.dot(p_ref[...], w1_ref[...], preferred_element_type=jnp.float32)
    t = jnp.maximum(t + b1_ref[...], 0.0)
    u = jnp.dot(t.astype(jnp.bfloat16), w2_ref[...],
                preferred_element_type=jnp.float32)
    o = x_ref[...] + u + b2_ref[...]
    if relu_out:
        o = jnp.maximum(o, 0.0)
    o_ref[...] = o.astype(o_ref.dtype)


def _resblock_vq_kernel(p_ref, w1_ref, b1_ref, w2_ref, b2_ref, x_ref,
                        e_ref, e2_ref, ze_ref, zq_ref):
    """Last encoder ResBlock fused with nearest-neighbour VQ (z_e stays in VMEM)."""
    t = jnp.dot(p_ref[...], w1_ref[...], preferred_element_type=jnp.float32)
    t = jnp.maximum(t + b1_ref[...], 0.0)
    u = jnp.dot(t.astype(jnp.bfloat16), w2_ref[...],
                preferred_element_type=jnp.float32)
    z = x_ref[...] + u + b2_ref[...]                           # (tm, CP) f32
    ze_ref[...] = z

    # distances against the resident (zero-padded) codebook; pads contribute 0.
    e = e_ref[...]                                             # (K, CP) f32
    z2 = jnp.sum(z * z, axis=-1, keepdims=True)                # (tm, 1)
    cross = jax.lax.dot_general(z, e, (((1,), (1,)), ((), ())),
                                preferred_element_type=jnp.float32)  # (tm, K)
    d = z2 - 2.0 * cross + e2_ref[...]                         # e2 precomputed

    # argmin with first-minimum tie-breaking (matches torch.min)
    dmin = jnp.min(d, axis=-1, keepdims=True)
    iota = jax.lax.broadcasted_iota(jnp.int32, d.shape, 1)
    big = jnp.iinfo(jnp.int32).max
    idx = jnp.min(jnp.where(d == dmin, iota, big), axis=-1, keepdims=True)

    # gather codebook rows via one-hot matmul (MXU-friendly, f32)
    onehot = (iota == idx).astype(jnp.float32)                 # (tm, K)
    zq_ref[...] = jnp.dot(onehot, e, preferred_element_type=jnp.float32)


# ----------------------------------------------------------------------------
# Pallas call wrappers
# ----------------------------------------------------------------------------
def matmul_bias(x, w, b, *, relu_out=False, out_dtype=jnp.float32,
                tile_m=TILE_M):
    """x: (M, K) bf16, w: (K, N) bf16, b: (1, N) f32 -> (M, N) out_dtype."""
    M, K = x.shape
    N = w.shape[-1]
    tm = M if M <= tile_m else tile_m
    grid = (pl.cdiv(M, tm),)
    flops = 2 * M * K * N
    bytes_accessed = (x.size * x.dtype.itemsize + w.size * 2 + b.size * 4
                      + M * N * jnp.dtype(out_dtype).itemsize)
    return pl.pallas_call(
        functools.partial(_mm_kernel, relu_out=relu_out),
        out_shape=jax.ShapeDtypeStruct((M, N), out_dtype),
        grid=grid,
        in_specs=[
            pl.BlockSpec((tm, K), lambda i: (i, 0)),
            pl.BlockSpec((K, N), lambda i: (0, 0)),    # weight resident
            pl.BlockSpec((1, N), lambda i: (0, 0)),    # bias resident
        ],
        out_specs=pl.BlockSpec((tm, N), lambda i: (i, 0)),
        compiler_params=pltpu.CompilerParams(
            dimension_semantics=("parallel",),
            vmem_limit_bytes=VMEM_LIMIT),
        cost_estimate=pl.CostEstimate(flops=int(flops), transcendentals=0,
                                      bytes_accessed=int(bytes_accessed)),
    )(x, w, b)


def resblock(x, rp, *, dim, relu_out=False, out_dtype=jnp.float32,
             tile_m=TILE_M):
    """Fused ResBlock: x + Conv1x1(ReLU(Conv3x3(ReLU(x)))), optional output ReLU.

    x: (B, H, W, CP) f32 with true channels in [:dim] and zero padding above.
    """
    B, H, W, CP = x.shape
    M = B * H * W
    xr = jnp.maximum(x[..., :dim], 0.0).astype(jnp.bfloat16)   # ReLU once, true chans
    patches, _ = _im2col(xr, 3, 3, 1, 1)                       # (M, 9*dim) bf16
    skip = x.reshape(M, CP).astype(jnp.float32)
    Kd = 9 * dim
    tm = M if M <= tile_m else tile_m
    grid = (pl.cdiv(M, tm),)
    flops = 2 * M * (Kd * CP + CP * CP)
    bytes_accessed = (patches.size * 2 + (Kd * CP + CP * CP) * 2
                      + M * CP * 4 + M * CP * jnp.dtype(out_dtype).itemsize)
    out = pl.pallas_call(
        functools.partial(_resblock_kernel, relu_out=relu_out),
        out_shape=jax.ShapeDtypeStruct((M, CP), out_dtype),
        grid=grid,
        in_specs=[
            pl.BlockSpec((tm, Kd), lambda i: (i, 0)),
            pl.BlockSpec((Kd, CP), lambda i: (0, 0)),
            pl.BlockSpec((1, CP), lambda i: (0, 0)),
            pl.BlockSpec((CP, CP), lambda i: (0, 0)),
            pl.BlockSpec((1, CP), lambda i: (0, 0)),
            pl.BlockSpec((tm, CP), lambda i: (i, 0)),
        ],
        out_specs=pl.BlockSpec((tm, CP), lambda i: (i, 0)),
        compiler_params=pltpu.CompilerParams(
            dimension_semantics=("parallel",),
            vmem_limit_bytes=VMEM_LIMIT),
        cost_estimate=pl.CostEstimate(flops=int(flops), transcendentals=0,
                                      bytes_accessed=int(bytes_accessed)),
    )(patches, rp['w1'], rp['b1'], rp['w2'], rp['b2'], skip)
    return out.reshape(B, H, W, CP)


def resblock_vq(x, rp, emb, e2, *, dim, tile_m=TILE_M):
    """Last encoder ResBlock fused with VQ -> (z_e, z_q), both (B,H,W,CP) f32."""
    B, H, W, CP = x.shape
    M = B * H * W
    Kc = emb.shape[0]
    xr = jnp.maximum(x[..., :dim], 0.0).astype(jnp.bfloat16)
    patches, _ = _im2col(xr, 3, 3, 1, 1)                       # (M, 9*dim) bf16
    skip = x.reshape(M, CP).astype(jnp.float32)
    Kd = 9 * dim
    tm = M if M <= tile_m else tile_m
    grid = (pl.cdiv(M, tm),)
    flops = 2 * M * (Kd * CP + CP * CP) + 4 * M * Kc * CP
    bytes_accessed = (patches.size * 2 + (Kd * CP + CP * CP) * 2
                      + Kc * CP * 4 + Kc * 4 + 3 * M * CP * 4)
    z_e, z_q = pl.pallas_call(
        _resblock_vq_kernel,
        out_shape=(jax.ShapeDtypeStruct((M, CP), jnp.float32),
                   jax.ShapeDtypeStruct((M, CP), jnp.float32)),
        grid=grid,
        in_specs=[
            pl.BlockSpec((tm, Kd), lambda i: (i, 0)),
            pl.BlockSpec((Kd, CP), lambda i: (0, 0)),
            pl.BlockSpec((1, CP), lambda i: (0, 0)),
            pl.BlockSpec((CP, CP), lambda i: (0, 0)),
            pl.BlockSpec((1, CP), lambda i: (0, 0)),
            pl.BlockSpec((tm, CP), lambda i: (i, 0)),
            pl.BlockSpec((Kc, CP), lambda i: (0, 0)),   # codebook resident
            pl.BlockSpec((1, Kc), lambda i: (0, 0)),    # precomputed ||e||^2
        ],
        out_specs=(pl.BlockSpec((tm, CP), lambda i: (i, 0)),
                   pl.BlockSpec((tm, CP), lambda i: (i, 0))),
        compiler_params=pltpu.CompilerParams(
            dimension_semantics=("parallel",),
            vmem_limit_bytes=VMEM_LIMIT),
        cost_estimate=pl.CostEstimate(flops=int(flops), transcendentals=0,
                                      bytes_accessed=int(bytes_accessed)),
    )(patches, rp['w1'], rp['b1'], rp['w2'], rp['b2'], skip, emb, e2)
    return z_e.reshape(B, H, W, CP), z_q.reshape(B, H, W, CP)


# ----------------------------------------------------------------------------
# JAX glue: im2col (bf16, true channels), conv / parity-folded conv-transpose
# ----------------------------------------------------------------------------
def _im2col(x, kh, kw, stride, pad):
    B, H, W, C = x.shape
    xp = jnp.pad(x, ((0, 0), (pad, pad), (pad, pad), (0, 0)))
    Ho = (H + 2 * pad - kh) // stride + 1
    Wo = (W + 2 * pad - kw) // stride + 1
    cols = []
    for di in range(kh):
        for dj in range(kw):
            cols.append(xp[:, di:di + stride * Ho:stride,
                           dj:dj + stride * Wo:stride, :])
    patches = jnp.concatenate(cols, axis=-1)                   # (B,Ho,Wo,kh*kw*C)
    return patches.reshape(B * Ho * Wo, kh * kw * C), (B, Ho, Wo)


def conv2d(x, w_mat, b, *, kh, kw, stride, pad, relu_out=False,
           out_dtype=jnp.float32):
    """x: NHWC (true channels); w_mat: (kh*kw*Cin, Npad) bf16; b: (1, Npad) f32."""
    patches, (B, Ho, Wo) = _im2col(x.astype(jnp.bfloat16), kh, kw, stride, pad)
    y = matmul_bias(patches, w_mat, b, relu_out=relu_out, out_dtype=out_dtype)
    return y.reshape(B, Ho, Wo, w_mat.shape[-1])


def conv_transpose2d(x, w_fold, b_fold, *, relu_out=False,
                     out_dtype=jnp.float32):
    """Parity-folded ConvTranspose2d(k=4, s=2, p=1).

    x: (B, H, W, Cin_true); w_fold: (9*Cin, 4*G) bf16 (G = per-parity out width,
    unused taps zeroed); b_fold: (1, 4*G) f32.  Output: (B, 2H, 2W, G).
    """
    B, H, W, _ = x.shape
    G = w_fold.shape[-1] // 4
    patches, _ = _im2col(x.astype(jnp.bfloat16), 3, 3, 1, 1)   # (B*H*W, 9*Cin)
    y = matmul_bias(patches, w_fold, b_fold, relu_out=relu_out,
                    out_dtype=out_dtype)                       # (B*H*W, 4*G)
    y = y.reshape(B, H, W, 2, 2, G)                            # (b,h,w,r,s,o)
    y = jnp.transpose(y, (0, 1, 3, 2, 4, 5)).reshape(B, 2 * H, 2 * W, G)
    return y


# ----------------------------------------------------------------------------
# Parameter init (PyTorch-layout) + one-time matmul-weight preparation
# ----------------------------------------------------------------------------
def _xavier(key, shape):
    rf = shape[2] * shape[3]
    fan_in = shape[1] * rf
    fan_out = shape[0] * rf
    bound = (6.0 / (fan_in + fan_out)) ** 0.5
    return jax.random.uniform(key, shape, jnp.float32, -bound, bound)


def init_params(key, input_dim, output_dim, dim, K):
    """Raw PyTorch-layout params (mirrors weights_init: xavier W, zero bias)."""
    ks = jax.random.split(key, 13)

    def res(k1, k2):
        return {'w1': _xavier(k1, (dim, dim, 3, 3)),
                'b1': jnp.zeros((dim,), jnp.float32),
                'w2': _xavier(k2, (dim, dim, 1, 1)),
                'b2': jnp.zeros((dim,), jnp.float32)}

    return {
        'enc1_w': _xavier(ks[0], (dim, input_dim, 4, 4)),
        'enc1_b': jnp.zeros((dim,), jnp.float32),
        'enc2_w': _xavier(ks[1], (dim, dim, 4, 4)),
        'enc2_b': jnp.zeros((dim,), jnp.float32),
        'enc_res1': res(ks[2], ks[3]),
        'enc_res2': res(ks[4], ks[5]),
        'embedding': jax.random.uniform(ks[6], (K, dim), jnp.float32,
                                        -1.0 / K, 1.0 / K),
        'dec_res1': res(ks[7], ks[8]),
        'dec_res2': res(ks[9], ks[10]),
        'dec_t1_w': _xavier(ks[11], (dim, dim, 4, 4)),
        'dec_t1_b': jnp.zeros((dim,), jnp.float32),
        'dec_t2_w': _xavier(ks[12], (dim, output_dim, 4, 4)),
        'dec_t2_b': jnp.zeros((output_dim,), jnp.float32),
    }


def _conv_w_mat(w, out_pad):
    """(O, I, kh, kw) Conv2d weight -> (kh*kw*I, out_pad) bf16 (K unpadded)."""
    O, I, kh, kw = w.shape
    wm = jnp.transpose(w, (2, 3, 1, 0)).reshape(kh * kw * I, O)
    full = jnp.zeros((kh * kw * I, out_pad), jnp.float32).at[:, :O].set(wm)
    return full.astype(jnp.bfloat16)


def _conv1x1_w_mat(w, in_pad, out_pad):
    """(O, I, 1, 1) weight -> (in_pad, out_pad) bf16 (zero pad rows/cols)."""
    O, I, _, _ = w.shape
    full = jnp.zeros((in_pad, out_pad), jnp.float32).at[:I, :O].set(w[:, :, 0, 0].T)
    return full.astype(jnp.bfloat16)


def _pad_bias(b, out_pad):
    return jnp.zeros((1, out_pad), jnp.float32).at[0, :b.shape[0]].set(b)


# parity r -> {3x3-window row di -> ConvT kernel row ky}; same table for columns.
_KY_TAB = ({0: 3, 1: 1}, {1: 2, 2: 0})


def _convT_fold_w(w, cout_group):
    """(I, O, 4, 4) ConvTranspose2d weight -> parity-folded (9*I, 4*cout_group) bf16.

    Output column ((r*2+s)*cout_group + o) of the folded matmul produces output
    pixel (2m+r, 2n+s); taps a parity does not use are zero.
    """
    I, O, kh, kw = w.shape
    assert kh == 4 and kw == 4
    wf = jnp.zeros((3, 3, I, 2, 2, cout_group), jnp.float32)
    for r in (0, 1):
        for s in (0, 1):
            for di, ky in _KY_TAB[r].items():
                for dj, kx in _KY_TAB[s].items():
                    wf = wf.at[di, dj, :, r, s, :O].set(w[:, :, ky, kx])
    return wf.reshape(9 * I, 4 * cout_group).astype(jnp.bfloat16)


def _convT_fold_bias(b, cout_group):
    bf = jnp.zeros((4, cout_group), jnp.float32).at[:, :b.shape[0]].set(
        jnp.broadcast_to(b[None, :], (4, b.shape[0])))
    return bf.reshape(1, 4 * cout_group)


def _prep_res(rp, dim, cp):
    return {'w1': _conv_w_mat(rp['w1'], cp),
            'b1': _pad_bias(rp['b1'], cp),
            'w2': _conv1x1_w_mat(rp['w2'], cp, cp),
            'b2': _pad_bias(rp['b2'], cp)}


def prepare_params(raw, *, input_dim, output_dim, dim, K):
    """Pre-cast matmul weights to bf16; pad only output (N) dims to lane width."""
    del input_dim
    cp = _round_up(dim, LANE)                 # lane-padded activation width
    g1 = _round_up(dim, LANE // 4)            # per-parity width for ConvT1
    g2 = _round_up(output_dim, LANE // 4)     # per-parity width for ConvT2
    emb = raw['embedding']
    return {
        'enc1_w': _conv_w_mat(raw['enc1_w'], cp),
        'enc1_b': _pad_bias(raw['enc1_b'], cp),
        'enc2_w': _conv_w_mat(raw['enc2_w'], cp),
        'enc2_b': _pad_bias(raw['enc2_b'], cp),
        'enc_res1': _prep_res(raw['enc_res1'], dim, cp),
        'enc_res2': _prep_res(raw['enc_res2'], dim, cp),
        'embedding': jnp.zeros((K, cp), jnp.float32).at[:, :dim].set(emb),
        'emb_sq': jnp.sum(emb * emb, axis=1)[None, :],          # (1, K) f32
        'dec_res1': _prep_res(raw['dec_res1'], dim, cp),
        'dec_res2': _prep_res(raw['dec_res2'], dim, cp),
        'dec_t1_w': _convT_fold_w(raw['dec_t1_w'], g1),
        'dec_t1_b': _convT_fold_bias(raw['dec_t1_b'], g1),
        'dec_t2_w': _convT_fold_w(raw['dec_t2_w'], g2),
        'dec_t2_b': _convT_fold_bias(raw['dec_t2_b'], g2),
    }


# ----------------------------------------------------------------------------
# Full forward pass (== VectorQuantizedVAE.forward)
# ----------------------------------------------------------------------------
def vqvae_forward(params, x_nchw, *, dim, output_dim):
    x = jnp.transpose(x_nchw, (0, 2, 3, 1))                    # NHWC, true chans

    # --- encoder ---
    h = conv2d(x, params['enc1_w'], params['enc1_b'], kh=4, kw=4, stride=2,
               pad=1, relu_out=True, out_dtype=jnp.bfloat16)
    h = conv2d(h[..., :dim], params['enc2_w'], params['enc2_b'], kh=4, kw=4,
               stride=2, pad=1, out_dtype=jnp.float32)
    h = resblock(h, params['enc_res1'], dim=dim)
    # last encoder ResBlock fused with nearest-neighbour VQ
    z_e, z_q = resblock_vq(h, params['enc_res2'], params['embedding'],
                           params['emb_sq'], dim=dim)

    # --- decoder ---
    d = resblock(z_q, params['dec_res1'], dim=dim)
    d = resblock(d, params['dec_res2'], dim=dim, relu_out=True,
                 out_dtype=jnp.bfloat16)                       # fused decoder ReLU
    d = conv_transpose2d(d[..., :dim], params['dec_t1_w'], params['dec_t1_b'],
                         relu_out=True, out_dtype=jnp.bfloat16)
    d = conv_transpose2d(d[..., :dim], params['dec_t2_w'], params['dec_t2_b'],
                         out_dtype=jnp.float32)

    # slice lane padding back to the public channel widths
    x_tilde = d[..., :output_dim]
    z_e = z_e[..., :dim]
    z_q = z_q[..., :dim]
    to_nchw = lambda t: jnp.transpose(t, (0, 3, 1, 2))
    return to_nchw(x_tilde), to_nchw(z_e), to_nchw(z_q)


# ----------------------------------------------------------------------------
if __name__ == "__main__":
    key = jax.random.PRNGKey(0)
    kp, kx = jax.random.split(key)

    input_dim, output_dim, dim, K = 4, 4, 32, 512
    B, H, W = 2, 16, 16

    raw = init_params(kp, input_dim, output_dim, dim, K)
    params = prepare_params(raw, input_dim=input_dim, output_dim=output_dim,
                            dim=dim, K=K)
    x = jax.random.normal(kx, (B, input_dim, H, W), jnp.float32)

    fwd = jax.jit(functools.partial(vqvae_forward, dim=dim,
                                    output_dim=output_dim))
    x_tilde, z_e_x, z_q_x = fwd(params, x)
    jax.block_until_ready((x_tilde, z_e_x, z_q_x))

    assert x_tilde.shape == (B, output_dim, H, W)
    assert z_e_x.shape == (B, dim, H // 4, W // 4)
    assert z_q_x.shape == (B, dim, H // 4, W // 4)
    assert x_tilde.dtype == jnp.float32
    assert bool(jnp.all(jnp.isfinite(x_tilde)))
    # every quantized latent must (numerically) be a codebook row
    zq_rows = jnp.transpose(z_q_x, (0, 2, 3, 1)).reshape(-1, dim)
    dist = jnp.sum((zq_rows[:, None, :] - raw['embedding'][None, :, :]) ** 2,
                   axis=-1)
    assert bool(jnp.all(jnp.min(dist, axis=-1) < 1e-6))

    print("KERNEL_OK")
</pallas_src>

<mosaic_0001>
module attributes {stable_mosaic.version = 11 : i64} {
  func.func @_mm_kernel(%arg0: i32, %arg1: memref<128x64xbf16, #tpu.memory_space<vmem>>, %arg2: memref<64x128xbf16, #tpu.memory_space<vmem>>, %arg3: memref<1x128xf32, #tpu.memory_space<vmem>>, %arg4: memref<128x128xbf16, #tpu.memory_space<vmem>>) attributes {dimension_semantics = [#tpu.dimension_semantics<parallel>], iteration_bounds = array<i64: 1>, scalar_prefetch = 0 : i64, scratch_operands = 0 : i64, tpu.core_type = #tpu.core_type<tc>, window_params = [{transform_indices = @transform_0, window_bounds = array<i64: 128, 64>}, {pipeline_mode = #tpu.pipeline_mode<synchronous>, transform_indices = @transform_1, window_bounds = array<i64: 64, 128>}, {pipeline_mode = #tpu.pipeline_mode<synchronous>, transform_indices = @transform_2, window_bounds = array<i64: 1, 128>}, {transform_indices = @transform_3, window_bounds = array<i64: 128, 128>}]} {
    %c0 = arith.constant 0 : index
    %c0_0 = arith.constant 0 : index
    %0 = vector.load %arg1[%c0, %c0_0] : memref<128x64xbf16, #tpu.memory_space<vmem>>, vector<128x64xbf16>
    %c0_1 = arith.constant 0 : index
    %c0_2 = arith.constant 0 : index
    %1 = vector.load %arg2[%c0_1, %c0_2] : memref<64x128xbf16, #tpu.memory_space<vmem>>, vector<64x128xbf16>
    %cst = arith.constant dense<0.000000e+00> : vector<128x128xf32>
    %2 = tpu.matmul %0, %1, %cst {dimension_numbers = #tpu.dot_dimension_numbers<[1], [0], [0], [1], [0, 0, 1, 1], [], []>} : vector<128x64xbf16>, vector<64x128xbf16>, vector<128x128xf32> -> vector<128x128xf32>
    %c0_3 = arith.constant 0 : index
    %c0_4 = arith.constant 0 : index
    %3 = vector.load %arg3[%c0_3, %c0_4] : memref<1x128xf32, #tpu.memory_space<vmem>>, vector<1x128xf32>
    %4 = vector.broadcast %3 : vector<1x128xf32> to vector<128x128xf32>
    %5 = arith.addf %2, %4 : vector<128x128xf32>
    %cst_5 = arith.constant 0.000000e+00 : f32
    %6 = vector.broadcast %cst_5 : f32 to vector<128x128xf32>
    %7 = arith.maximumf %5, %6 : vector<128x128xf32>
    %8 = arith.truncf %7 : vector<128x128xf32> to vector<128x128xbf16>
    %c0_6 = arith.constant 0 : index
    %c0_7 = arith.constant 0 : index
    %9 = vector.load %arg4[%c0_6, %c0_7] : memref<128x128xbf16, #tpu.memory_space<vmem>>, vector<128x128xbf16>
    tpu.vector_store %arg4[%c0_6, %c0_7], %8 {strides = array<i32>} : memref<128x128xbf16, #tpu.memory_space<vmem>>, vector<128x128xbf16>,
    return
  }
  func.func @transform_0(%arg0: i32) -> (i32, i32) {
    %c0_i32 = arith.constant 0 : i32
    %c0_i32_0 = arith.constant 0 : i32
    return %arg0, %c0_i32 : i32, i32
  }
  func.func @transform_1(%arg0: i32) -> (i32, i32) {
    %c0_i32 = arith.constant 0 : i32
    %c0_i32_0 = arith.constant 0 : i32
    %c0_i32_1 = arith.constant 0 : i32
    return %c0_i32, %c0_i32_0 : i32, i32
  }
  func.func @transform_2(%arg0: i32) -> (i32, i32) {
    %c0_i32 = arith.constant 0 : i32
    %c0_i32_0 = arith.constant 0 : i32
    %c0_i32_1 = arith.constant 0 : i32
    return %c0_i32, %c0_i32_0 : i32, i32
  }
  func.func @transform_3(%arg0: i32) -> (i32, i32) {
    %c0_i32 = arith.constant 0 : i32
    %c0_i32_0 = arith.constant 0 : i32
    return %arg0, %c0_i32 : i32, i32
  }
}

module attributes {stable_mosaic.version = 11 : i64} {
  func.func @_mm_kernel(%arg0: i32, %arg1: memref<32x512xbf16, #tpu.memory_space<vmem>>, %arg2: memref<512x128xbf16, #tpu.memory_space<vmem>>, %arg3: memref<1x128xf32, #tpu.memory_space<vmem>>, %arg4: memref<32x128xf32, #tpu.memory_space<vmem>>) attributes {dimension_semantics = [#tpu.dimension_semantics<parallel>], iteration_bounds = array<i64: 1>, scalar_prefetch = 0 : i64, scratch_operands = 0 : i64, tpu.core_type = #tpu.core_type<tc>, window_params = [{transform_indices = @transform_0, window_bounds = array<i64: 32, 512>}, {pipeline_mode = #tpu.pipeline_mode<synchronous>, transform_indices = @transform_1, window_bounds = array<i64: 512, 128>}, {pipeline_mode = #tpu.pipeline_mode<synchronous>, transform_indices = @transform_2, window_bounds = array<i64: 1, 128>}, {transform_indices = @transform_3, window_bounds = array<i64: 32, 128>}]} {
    %c0 = arith.constant 0 : index
    %c0_0 = arith.constant 0 : index
    %0 = vector.load %arg1[%c0, %c0_0] : memref<32x512xbf16, #tpu.memory_space<vmem>>, vector<32x512xbf16>
    %c0_1 = arith.constant 0 : index
    %c0_2 = arith.constant 0 : index
    %1 = vector.load %arg2[%c0_1, %c0_2] : memref<512x128xbf16, #tpu.memory_space<vmem>>, vector<512x128xbf16>
    %cst = arith.constant dense<0.000000e+00> : vector<32x128xf32>
    %2 = tpu.matmul %0, %1, %cst {dimension_numbers = #tpu.dot_dimension_numbers<[1], [0], [0], [1], [0, 0, 1, 1], [], []>} : vector<32x512xbf16>, vector<512x128xbf16>, vector<32x128xf32> -> vector<32x128xf32>
    %c0_3 = arith.constant 0 : index
    %c0_4 = arith.constant 0 : index
    %3 = vector.load %arg3[%c0_3, %c0_4] : memref<1x128xf32, #tpu.memory_space<vmem>>, vector<1x128xf32>
    %4 = vector.broadcast %3 : vector<1x128xf32> to vector<32x128xf32>
    %5 = arith.addf %2, %4 : vector<32x128xf32>
    %c0_5 = arith.constant 0 : index
    %c0_6 = arith.constant 0 : index
    %6 = vector.load %arg4[%c0_5, %c0_6] : memref<32x128xf32, #tpu.memory_space<vmem>>, vector<32x128xf32>
    tpu.vector_store %arg4[%c0_5, %c0_6], %5 {strides = array<i32>} : memref<32x128xf32, #tpu.memory_space<vmem>>, vector<32x128xf32>,
    return
  }
  func.func @transform_0(%arg0: i32) -> (i32, i32) {
    %c0_i32 = arith.constant 0 : i32
    %c0_i32_0 = arith.constant 0 : i32
    return %arg0, %c0_i32 : i32, i32
  }
  func.func @transform_1(%arg0: i32) -> (i32, i32) {
    %c0_i32 = arith.constant 0 : i32
    %c0_i32_0 = arith.constant 0 : i32
    %c0_i32_1 = arith.constant 0 : i32
    return %c0_i32, %c0_i32_0 : i32, i32
  }
  func.func @transform_2(%arg0: i32) -> (i32, i32) {
    %c0_i32 = arith.constant 0 : i32
    %c0_i32_0 = arith.constant 0 : i32
    %c0_i32_1 = arith.constant 0 : i32
    return %c0_i32, %c0_i32_0 : i32, i32
  }
  func.func @transform_3(%arg0: i32) -> (i32, i32) {
    %c0_i32 = arith.constant 0 : i32
    %c0_i32_0 = arith.constant 0 : i32
    return %arg0, %c0_i32 : i32, i32
  }
}

module attributes {stable_mosaic.version = 11 : i64} {
  func.func @_resblock_kernel(%arg0: i32, %arg1: memref<32x288xbf16, #tpu.memory_space<vmem>>, %arg2: memref<288x128xbf16, #tpu.memory_space<vmem>>, %arg3: memref<1x128xf32, #tpu.memory_space<vmem>>, %arg4: memref<128x128xbf16, #tpu.memory_space<vmem>>, %arg5: memref<1x128xf32, #tpu.memory_space<vmem>>, %arg6: memref<32x128xf32, #tpu.memory_space<vmem>>, %arg7: memref<32x128xf32, #tpu.memory_space<vmem>>) attributes {dimension_semantics = [#tpu.dimension_semantics<parallel>], iteration_bounds = array<i64: 1>, scalar_prefetch = 0 : i64, scratch_operands = 0 : i64, tpu.core_type = #tpu.core_type<tc>, window_params = [{transform_indices = @transform_0, window_bounds = array<i64: 32, 288>}, {pipeline_mode = #tpu.pipeline_mode<synchronous>, transform_indices = @transform_1, window_bounds = array<i64: 288, 128>}, {pipeline_mode = #tpu.pipeline_mode<synchronous>, transform_indices = @transform_2, window_bounds = array<i64: 1, 128>}, {pipeline_mode = #tpu.pipeline_mode<synchronous>, transform_indices = @transform_3, window_bounds = array<i64: 128, 128>}, {pipeline_mode = #tpu.pipeline_mode<synchronous>, transform_indices = @transform_4, window_bounds = array<i64: 1, 128>}, {transform_indices = @transform_5, window_bounds = array<i64: 32, 128>}, {transform_indices = @transform_6, window_bounds = array<i64: 32, 128>}]} {
    %c0 = arith.constant 0 : index
    %c0_0 = arith.constant 0 : index
    %0 = vector.load %arg1[%c0, %c0_0] : memref<32x288xbf16, #tpu.memory_space<vmem>>, vector<32x288xbf16>
    %c0_1 = arith.constant 0 : index
    %c0_2 = arith.constant 0 : index
    %1 = vector.load %arg2[%c0_1, %c0_2] : memref<288x128xbf16, #tpu.memory_space<vmem>>, vector<288x128xbf16>
    %cst = arith.constant dense<0.000000e+00> : vector<32x128xf32>
    %2 = tpu.matmul %0, %1, %cst {dimension_numbers = #tpu.dot_dimension_numbers<[1], [0], [0], [1], [0, 0, 1, 1], [], []>} : vector<32x288xbf16>, vector<288x128xbf16>, vector<32x128xf32> -> vector<32x128xf32>
    %c0_3 = arith.constant 0 : index
    %c0_4 = arith.constant 0 : index
    %3 = vector.load %arg3[%c0_3, %c0_4] : memref<1x128xf32, #tpu.memory_space<vmem>>, vector<1x128xf32>
    %4 = vector.broadcast %3 : vector<1x128xf32> to vector<32x128xf32>
    %5 = arith.addf %2, %4 : vector<32x128xf32>
    %cst_5 = arith.constant 0.000000e+00 : f32
    %6 = vector.broadcast %cst_5 : f32 to vector<32x128xf32>
    %7 = arith.maximumf %5, %6 : vector<32x128xf32>
    %8 = arith.truncf %7 : vector<32x128xf32> to vector<32x128xbf16>
    %c0_6 = arith.constant 0 : index
    %c0_7 = arith.constant 0 : index
    %9 = vector.load %arg4[%c0_6, %c0_7] : memref<128x128xbf16, #tpu.memory_space<vmem>>, vector<128x128xbf16>
    %cst_8 = arith.constant dense<0.000000e+00> : vector<32x128xf32>
    %10 = tpu.matmul %8, %9, %cst_8 {dimension_numbers = #tpu.dot_dimension_numbers<[1], [0], [0], [1], [0, 0, 1, 1], [], []>} : vector<32x128xbf16>, vector<128x128xbf16>, vector<32x128xf32> -> vector<32x128xf32>
    %c0_9 = arith.constant 0 : index
    %c0_10 = arith.constant 0 : index
    %11 = vector.load %arg6[%c0_9, %c0_10] : memref<32x128xf32, #tpu.memory_space<vmem>>, vector<32x128xf32>
    %12 = arith.addf %11, %10 : vector<32x128xf32>
    %c0_11 = arith.constant 0 : index
    %c0_12 = arith.constant 0 : index
    %13 = vector.load %arg5[%c0_11, %c0_12] : memref<1x128xf32, #tpu.memory_space<vmem>>, vector<1x128xf32>
    %14 = vector.broadcast %13 : vector<1x128xf32> to vector<32x128xf32>
    %15 = arith.addf %12, %14 : vector<32x128xf32>
    %c0_13 = arith.constant 0 : index
    %c0_14 = arith.constant 0 : index
    %16 = vector.load %arg7[%c0_13, %c0_14] : memref<32x128xf32, #tpu.memory_space<vmem>>, vector<32x128xf32>
    tpu.vector_store %arg7[%c0_13, %c0_14], %15 {strides = array<i32>} : memref<32x128xf32, #tpu.memory_space<vmem>>, vector<32x128xf32>,
    return
  }
  func.func @transform_0(%arg0: i32) -> (i32, i32) {
    %c0_i32 = arith.constant 0 : i32
    %c0_i32_0 = arith.constant 0 : i32
    return %arg0, %c0_i32 : i32, i32
  }
  func.func @transform_1(%arg0: i32) -> (i32, i32) {
    %c0_i32 = arith.constant 0 : i32
    %c0_i32_0 = arith.constant 0 : i32
    %c0_i32_1 = arith.constant 0 : i32
    return %c0_i32, %c0_i32_0 : i32, i32
  }
  func.func @transform_2(%arg0: i32) -> (i32, i32) {
    %c0_i32 = arith.constant 0 : i32
    %c0_i32_0 = arith.constant 0 : i32
    %c0_i32_1 = arith.constant 0 : i32
    return %c0_i32, %c0_i32_0 : i32, i32
  }
  func.func @transform_3(%arg0: i32) -> (i32, i32) {
    %c0_i32 = arith.constant 0 : i32
    %c0_i32_0 = arith.constant 0 : i32
    %c0_i32_1 = arith.constant 0 : i32
    return %c0_i32, %c0_i32_0 : i32, i32
  }
  func.func @transform_4(%arg0: i32) -> (i32, i32) {
    %c0_i32 = arith.constant 0 : i32
    %c0_i32_0 = arith.constant 0 : i32
    %c0_i32_1 = arith.constant 0 : i32
    return %c0_i32, %c0_i32_0 : i32, i32
  }
  func.func @transform_5(%arg0: i32) -> (i32, i32) {
    %c0_i32 = arith.constant 0 : i32
    %c0_i32_0 = arith.constant 0 : i32
    return %arg0, %c0_i32 : i32, i32
  }
  func.func @transform_6(%arg0: i32) -> (i32, i32) {
    %c0_i32 = arith.constant 0 : i32
    %c0_i32_0 = arith.constant 0 : i32
    return %arg0, %c0_i32 : i32, i32
  }
}

module attributes {stable_mosaic.version = 11 : i64} {
  func.func @_resblock_vq_kernel(%arg0: i32, %arg1: memref<32x288xbf16, #tpu.memory_space<vmem>>, %arg2: memref<288x128xbf16, #tpu.memory_space<vmem>>, %arg3: memref<1x128xf32, #tpu.memory_space<vmem>>, %arg4: memref<128x128xbf16, #tpu.memory_space<vmem>>, %arg5: memref<1x128xf32, #tpu.memory_space<vmem>>, %arg6: memref<32x128xf32, #tpu.memory_space<vmem>>, %arg7: memref<512x128xf32, #tpu.memory_space<vmem>>, %arg8: memref<1x512xf32, #tpu.memory_space<vmem>>, %arg9: memref<32x128xf32, #tpu.memory_space<vmem>>, %arg10: memref<32x128xf32, #tpu.memory_space<vmem>>) attributes {dimension_semantics = [#tpu.dimension_semantics<parallel>], iteration_bounds = array<i64: 1>, scalar_prefetch = 0 : i64, scratch_operands = 0 : i64, tpu.core_type = #tpu.core_type<tc>, window_params = [{transform_indices = @transform_0, window_bounds = array<i64: 32, 288>}, {pipeline_mode = #tpu.pipeline_mode<synchronous>, transform_indices = @transform_1, window_bounds = array<i64: 288, 128>}, {pipeline_mode = #tpu.pipeline_mode<synchronous>, transform_indices = @transform_2, window_bounds = array<i64: 1, 128>}, {pipeline_mode = #tpu.pipeline_mode<synchronous>, transform_indices = @transform_3, window_bounds = array<i64: 128, 128>}, {pipeline_mode = #tpu.pipeline_mode<synchronous>, transform_indices = @transform_4, window_bounds = array<i64: 1, 128>}, {transform_indices = @transform_5, window_bounds = array<i64: 32, 128>}, {pipeline_mode = #tpu.pipeline_mode<synchronous>, transform_indices = @transform_6, window_bounds = array<i64: 512, 128>}, {pipeline_mode = #tpu.pipeline_mode<synchronous>, transform_indices = @transform_7, window_bounds = array<i64: 1, 512>}, {transform_indices = @transform_8, window_bounds = array<i64: 32, 128>}, {transform_indices = @transform_9, window_bounds = array<i64: 32, 128>}]} {
    %c0 = arith.constant 0 : index
    %c0_0 = arith.constant 0 : index
    %0 = vector.load %arg1[%c0, %c0_0] : memref<32x288xbf16, #tpu.memory_space<vmem>>, vector<32x288xbf16>
    %c0_1 = arith.constant 0 : index
    %c0_2 = arith.constant 0 : index
    %1 = vector.load %arg2[%c0_1, %c0_2] : memref<288x128xbf16, #tpu.memory_space<vmem>>, vector<288x128xbf16>
    %cst = arith.constant dense<0.000000e+00> : vector<32x128xf32>
    %2 = tpu.matmul %0, %1, %cst {dimension_numbers = #tpu.dot_dimension_numbers<[1], [0], [0], [1], [0, 0, 1, 1], [], []>} : vector<32x288xbf16>, vector<288x128xbf16>, vector<32x128xf32> -> vector<32x128xf32>
    %c0_3 = arith.constant 0 : index
    %c0_4 = arith.constant 0 : index
    %3 = vector.load %arg3[%c0_3, %c0_4] : memref<1x128xf32, #tpu.memory_space<vmem>>, vector<1x128xf32>
    %4 = vector.broadcast %3 : vector<1x128xf32> to vector<32x128xf32>
    %5 = arith.addf %2, %4 : vector<32x128xf32>
    %cst_5 = arith.constant 0.000000e+00 : f32
    %6 = vector.broadcast %cst_5 : f32 to vector<32x128xf32>
    %7 = arith.maximumf %5, %6 : vector<32x128xf32>
    %8 = arith.truncf %7 : vector<32x128xf32> to vector<32x128xbf16>
    %c0_6 = arith.constant 0 : index
    %c0_7 = arith.constant 0 : index
    %9 = vector.load %arg4[%c0_6, %c0_7] : memref<128x128xbf16, #tpu.memory_space<vmem>>, vector<128x128xbf16>
    %cst_8 = arith.constant dense<0.000000e+00> : vector<32x128xf32>
    %10 = tpu.matmul %8, %9, %cst_8 {dimension_numbers = #tpu.dot_dimension_numbers<[1], [0], [0], [1], [0, 0, 1, 1], [], []>} : vector<32x128xbf16>, vector<128x128xbf16>, vector<32x128xf32> -> vector<32x128xf32>
    %c0_9 = arith.constant 0 : index
    %c0_10 = arith.constant 0 : index
    %11 = vector.load %arg6[%c0_9, %c0_10] : memref<32x128xf32, #tpu.memory_space<vmem>>, vector<32x128xf32>
    %12 = arith.addf %11, %10 : vector<32x128xf32>
    %c0_11 = arith.constant 0 : index
    %c0_12 = arith.constant 0 : index
    %13 = vector.load %arg5[%c0_11, %c0_12] : memref<1x128xf32, #tpu.memory_space<vmem>>, vector<1x128xf32>
    %14 = vector.broadcast %13 : vector<1x128xf32> to vector<32x128xf32>
    %15 = arith.addf %12, %14 : vector<32x128xf32>
    %c0_13 = arith.constant 0 : index
    %c0_14 = arith.constant 0 : index
    %16 = vector.load %arg9[%c0_13, %c0_14] : memref<32x128xf32, #tpu.memory_space<vmem>>, vector<32x128xf32>
    tpu.vector_store %arg9[%c0_13, %c0_14], %15 {strides = array<i32>} : memref<32x128xf32, #tpu.memory_space<vmem>>, vector<32x128xf32>,
    %c0_15 = arith.constant 0 : index
    %c0_16 = arith.constant 0 : index
    %17 = vector.load %arg7[%c0_15, %c0_16] : memref<512x128xf32, #tpu.memory_space<vmem>>, vector<512x128xf32>
    %18 = arith.mulf %15, %15 : vector<32x128xf32>
    %cst_17 = arith.constant dense<0.000000e+00> : vector<32xf32>
    %19 = vector.multi_reduction <add>, %18, %cst_17 [1] : vector<32x128xf32> to vector<32xf32>
    %20 = vector.shape_cast %19 : vector<32xf32> to vector<32x1xf32>
    %cst_18 = arith.constant dense<0.000000e+00> : vector<32x512xf32>
    %21 = tpu.matmul %15, %17, %cst_18 {dimension_numbers = #tpu.dot_dimension_numbers<[1], [1], [0], [0], [0, 0, 1, 0], [], []>} : vector<32x128xf32>, vector<512x128xf32>, vector<32x512xf32> -> vector<32x512xf32>
    %cst_19 = arith.constant 2.000000e+00 : f32
    %22 = vector.broadcast %cst_19 : f32 to vector<32x512xf32>
    %23 = arith.mulf %22, %21 : vector<32x512xf32>
    %24 = vector.broadcast %20 : vector<32x1xf32> to vector<32x512xf32>
    %25 = arith.subf %24, %23 : vector<32x512xf32>
    %c0_20 = arith.constant 0 : index
    %c0_21 = arith.constant 0 : index
    %26 = vector.load %arg8[%c0_20, %c0_21] : memref<1x512xf32, #tpu.memory_space<vmem>>, vector<1x512xf32>
    %27 = vector.broadcast %26 : vector<1x512xf32> to vector<32x512xf32>
    %28 = arith.addf %25, %27 : vector<32x512xf32>
    %cst_22 = arith.constant dense<0x7F800000> : vector<32xf32>
    %29 = vector.multi_reduction <minimumf>, %28, %cst_22 [1] : vector<32x512xf32> to vector<32xf32>
    %30 = vector.shape_cast %29 : vector<32xf32> to vector<32x1xf32>
    %31 = tpu.iota {dimensions = array<i32: 1>} : vector<32x512xi32>
    %32 = vector.broadcast %30 : vector<32x1xf32> to vector<32x512xf32>
    %33 = arith.cmpf oeq, %28, %32 : vector<32x512xf32>
    %c2147483647_i32 = arith.constant 2147483647 : i32
    %34 = vector.broadcast %c2147483647_i32 : i32 to vector<32x512xi32>
    %35 = arith.select %33, %31, %34 : vector<32x512xi1>, vector<32x512xi32>
    %cst_23 = arith.constant dense<2147483647> : vector<32xi32>
    %36 = vector.multi_reduction <minsi>, %35, %cst_23 [1] : vector<32x512xi32> to vector<32xi32>
    %37 = vector.shape_cast %36 : vector<32xi32> to vector<32x1xi32>
    %38 = vector.broadcast %37 : vector<32x1xi32> to vector<32x512xi32>
    %39 = arith.cmpi eq, %31, %38 : vector<32x512xi32>
    %40 = arith.extui %39 : vector<32x512xi1> to vector<32x512xi32>
    %41 = arith.sitofp %40 : vector<32x512xi32> to vector<32x512xf32>
    %cst_24 = arith.constant dense<0.000000e+00> : vector<32x128xf32>
    %42 = tpu.matmul %41, %17, %cst_24 {dimension_numbers = #tpu.dot_dimension_numbers<[1], [0], [0], [1], [0, 0, 1, 1], [], []>} : vector<32x512xf32>, vector<512x128xf32>, vector<32x128xf32> -> vector<32x128xf32>
    %c0_25 = arith.constant 0 : index
    %c0_26 = arith.constant 0 : index
    %43 = vector.load %arg10[%c0_25, %c0_26] : memref<32x128xf32, #tpu.memory_space<vmem>>, vector<32x128xf32>
    tpu.vector_store %arg10[%c0_25, %c0_26], %42 {strides = array<i32>} : memref<32x128xf32, #tpu.memory_space<vmem>>, vector<32x128xf32>,
    return
  }
  func.func @transform_0(%arg0: i32) -> (i32, i32) {
    %c0_i32 = arith.constant 0 : i32
    %c0_i32_0 = arith.constant 0 : i32
    return %arg0, %c0_i32 : i32, i32
  }
  func.func @transform_1(%arg0: i32) -> (i32, i32) {
    %c0_i32 = arith.constant 0 : i32
    %c0_i32_0 = arith.constant 0 : i32
    %c0_i32_1 = arith.constant 0 : i32
    return %c0_i32, %c0_i32_0 : i32, i32
  }
  func.func @transform_2(%arg0: i32) -> (i32, i32) {
    %c0_i32 = arith.constant 0 : i32
    %c0_i32_0 = arith.constant 0 : i32
    %c0_i32_1 = arith.constant 0 : i32
    return %c0_i32, %c0_i32_0 : i32, i32
  }
  func.func @transform_3(%arg0: i32) -> (i32, i32) {
    %c0_i32 = arith.constant 0 : i32
    %c0_i32_0 = arith.constant 0 : i32
    %c0_i32_1 = arith.constant 0 : i32
    return %c0_i32, %c0_i32_0 : i32, i32
  }
  func.func @transform_4(%arg0: i32) -> (i32, i32) {
    %c0_i32 = arith.constant 0 : i32
    %c0_i32_0 = arith.constant 0 : i32
    %c0_i32_1 = arith.constant 0 : i32
    return %c0_i32, %c0_i32_0 : i32, i32
  }
  func.func @transform_5(%arg0: i32) -> (i32, i32) {
    %c0_i32 = arith.constant 0 : i32
    %c0_i32_0 = arith.constant 0 : i32
    return %arg0, %c0_i32 : i32, i32
  }
  func.func @transform_6(%arg0: i32) -> (i32, i32) {
    %c0_i32 = arith.constant 0 : i32
    %c0_i32_0 = arith.constant 0 : i32
    %c0_i32_1 = arith.constant 0 : i32
    return %c0_i32, %c0_i32_0 : i32, i32
  }
  func.func @transform_7(%arg0: i32) -> (i32, i32) {
    %c0_i32 = arith.constant 0 : i32
    %c0_i32_0 = arith.constant 0 : i32
    %c0_i32_1 = arith.constant 0 : i32
    return %c0_i32, %c0_i32_0 : i32, i32
  }
  func.func @transform_8(%arg0: i32) -> (i32, i32) {
    %c0_i32 = arith.constant 0 : i32
    %c0_i32_0 = arith.constant 0 : i32
    return %arg0, %c0_i32 : i32, i32
  }
  func.func @transform_9(%arg0: i32) -> (i32, i32) {
    %c0_i32 = arith.constant 0 : i32
    %c0_i32_0 = arith.constant 0 : i32
    return %arg0, %c0_i32 : i32, i32
  }
}

module attributes {stable_mosaic.version = 11 : i64} {
  func.func @_mm_kernel(%arg0: i32, %arg1: memref<32x288xbf16, #tpu.memory_space<vmem>>, %arg2: memref<288x128xbf16, #tpu.memory_space<vmem>>, %arg3: memref<1x128xf32, #tpu.memory_space<vmem>>, %arg4: memref<32x128xbf16, #tpu.memory_space<vmem>>) attributes {dimension_semantics = [#tpu.dimension_semantics<parallel>], iteration_bounds = array<i64: 1>, scalar_prefetch = 0 : i64, scratch_operands = 0 : i64, tpu.core_type = #tpu.core_type<tc>, window_params = [{transform_indices = @transform_0, window_bounds = array<i64: 32, 288>}, {pipeline_mode = #tpu.pipeline_mode<synchronous>, transform_indices = @transform_1, window_bounds = array<i64: 288, 128>}, {pipeline_mode = #tpu.pipeline_mode<synchronous>, transform_indices = @transform_2, window_bounds = array<i64: 1, 128>}, {transform_indices = @transform_3, window_bounds = array<i64: 32, 128>}]} {
    %c0 = arith.constant 0 : index
    %c0_0 = arith.constant 0 : index
    %0 = vector.load %arg1[%c0, %c0_0] : memref<32x288xbf16, #tpu.memory_space<vmem>>, vector<32x288xbf16>
    %c0_1 = arith.constant 0 : index
    %c0_2 = arith.constant 0 : index
    %1 = vector.load %arg2[%c0_1, %c0_2] : memref<288x128xbf16, #tpu.memory_space<vmem>>, vector<288x128xbf16>
    %cst = arith.constant dense<0.000000e+00> : vector<32x128xf32>
    %2 = tpu.matmul %0, %1, %cst {dimension_numbers = #tpu.dot_dimension_numbers<[1], [0], [0], [1], [0, 0, 1, 1], [], []>} : vector<32x288xbf16>, vector<288x128xbf16>, vector<32x128xf32> -> vector<32x128xf32>
    %c0_3 = arith.constant 0 : index
    %c0_4 = arith.constant 0 : index
    %3 = vector.load %arg3[%c0_3, %c0_4] : memref<1x128xf32, #tpu.memory_space<vmem>>, vector<1x128xf32>
    %4 = vector.broadcast %3 : vector<1x128xf32> to vector<32x128xf32>
    %5 = arith.addf %2, %4 : vector<32x128xf32>
    %cst_5 = arith.constant 0.000000e+00 : f32
    %6 = vector.broadcast %cst_5 : f32 to vector<32x128xf32>
    %7 = arith.maximumf %5, %6 : vector<32x128xf32>
    %8 = arith.truncf %7 : vector<32x128xf32> to vector<32x128xbf16>
    %c0_6 = arith.constant 0 : index
    %c0_7 = arith.constant 0 : index
    %9 = vector.load %arg4[%c0_6, %c0_7] : memref<32x128xbf16, #tpu.memory_space<vmem>>, vector<32x128xbf16>
    tpu.vector_store %arg4[%c0_6, %c0_7], %8 {strides = array<i32>} : memref<32x128xbf16, #tpu.memory_space<vmem>>, vector<32x128xbf16>,
    return
  }
  func.func @transform_0(%arg0: i32) -> (i32, i32) {
    %c0_i32 = arith.constant 0 : i32
    %c0_i32_0 = arith.constant 0 : i32
    return %arg0, %c0_i32 : i32, i32
  }
  func.func @transform_1(%arg0: i32) -> (i32, i32) {
    %c0_i32 = arith.constant 0 : i32
    %c0_i32_0 = arith.constant 0 : i32
    %c0_i32_1 = arith.constant 0 : i32
    return %c0_i32, %c0_i32_0 : i32, i32
  }
  func.func @transform_2(%arg0: i32) -> (i32, i32) {
    %c0_i32 = arith.constant 0 : i32
    %c0_i32_0 = arith.constant 0 : i32
    %c0_i32_1 = arith.constant 0 : i32
    return %c0_i32, %c0_i32_0 : i32, i32
  }
  func.func @transform_3(%arg0: i32) -> (i32, i32) {
    %c0_i32 = arith.constant 0 : i32
    %c0_i32_0 = arith.constant 0 : i32
    return %arg0, %c0_i32 : i32, i32
  }
}

module attributes {stable_mosaic.version = 11 : i64} {
  func.func @_resblock_kernel(%arg0: i32, %arg1: memref<32x288xbf16, #tpu.memory_space<vmem>>, %arg2: memref<288x128xbf16, #tpu.memory_space<vmem>>, %arg3: memref<1x128xf32, #tpu.memory_space<vmem>>, %arg4: memref<128x128xbf16, #tpu.memory_space<vmem>>, %arg5: memref<1x128xf32, #tpu.memory_space<vmem>>, %arg6: memref<32x128xf32, #tpu.memory_space<vmem>>, %arg7: memref<32x128xbf16, #tpu.memory_space<vmem>>) attributes {dimension_semantics = [#tpu.dimension_semantics<parallel>], iteration_bounds = array<i64: 1>, scalar_prefetch = 0 : i64, scratch_operands = 0 : i64, tpu.core_type = #tpu.core_type<tc>, window_params = [{transform_indices = @transform_0, window_bounds = array<i64: 32, 288>}, {pipeline_mode = #tpu.pipeline_mode<synchronous>, transform_indices = @transform_1, window_bounds = array<i64: 288, 128>}, {pipeline_mode = #tpu.pipeline_mode<synchronous>, transform_indices = @transform_2, window_bounds = array<i64: 1, 128>}, {pipeline_mode = #tpu.pipeline_mode<synchronous>, transform_indices = @transform_3, window_bounds = array<i64: 128, 128>}, {pipeline_mode = #tpu.pipeline_mode<synchronous>, transform_indices = @transform_4, window_bounds = array<i64: 1, 128>}, {transform_indices = @transform_5, window_bounds = array<i64: 32, 128>}, {transform_indices = @transform_6, window_bounds = array<i64: 32, 128>}]} {
    %c0 = arith.constant 0 : index
    %c0_0 = arith.constant 0 : index
    %0 = vector.load %arg1[%c0, %c0_0] : memref<32x288xbf16, #tpu.memory_space<vmem>>, vector<32x288xbf16>
    %c0_1 = arith.constant 0 : index
    %c0_2 = arith.constant 0 : index
    %1 = vector.load %arg2[%c0_1, %c0_2] : memref<288x128xbf16, #tpu.memory_space<vmem>>, vector<288x128xbf16>
    %cst = arith.constant dense<0.000000e+00> : vector<32x128xf32>
    %2 = tpu.matmul %0, %1, %cst {dimension_numbers = #tpu.dot_dimension_numbers<[1], [0], [0], [1], [0, 0, 1, 1], [], []>} : vector<32x288xbf16>, vector<288x128xbf16>, vector<32x128xf32> -> vector<32x128xf32>
    %c0_3 = arith.constant 0 : index
    %c0_4 = arith.constant 0 : index
    %3 = vector.load %arg3[%c0_3, %c0_4] : memref<1x128xf32, #tpu.memory_space<vmem>>, vector<1x128xf32>
    %4 = vector.broadcast %3 : vector<1x128xf32> to vector<32x128xf32>
    %5 = arith.addf %2, %4 : vector<32x128xf32>
    %cst_5 = arith.constant 0.000000e+00 : f32
    %6 = vector.broadcast %cst_5 : f32 to vector<32x128xf32>
    %7 = arith.maximumf %5, %6 : vector<32x128xf32>
    %8 = arith.truncf %7 : vector<32x128xf32> to vector<32x128xbf16>
    %c0_6 = arith.constant 0 : index
    %c0_7 = arith.constant 0 : index
    %9 = vector.load %arg4[%c0_6, %c0_7] : memref<128x128xbf16, #tpu.memory_space<vmem>>, vector<128x128xbf16>
    %cst_8 = arith.constant dense<0.000000e+00> : vector<32x128xf32>
    %10 = tpu.matmul %8, %9, %cst_8 {dimension_numbers = #tpu.dot_dimension_numbers<[1], [0], [0], [1], [0, 0, 1, 1], [], []>} : vector<32x128xbf16>, vector<128x128xbf16>, vector<32x128xf32> -> vector<32x128xf32>
    %c0_9 = arith.constant 0 : index
    %c0_10 = arith.constant 0 : index
    %11 = vector.load %arg6[%c0_9, %c0_10] : memref<32x128xf32, #tpu.memory_space<vmem>>, vector<32x128xf32>
    %12 = arith.addf %11, %10 : vector<32x128xf32>
    %c0_11 = arith.constant 0 : index
    %c0_12 = arith.constant 0 : index
    %13 = vector.load %arg5[%c0_11, %c0_12] : memref<1x128xf32, #tpu.memory_space<vmem>>, vector<1x128xf32>
    %14 = vector.broadcast %13 : vector<1x128xf32> to vector<32x128xf32>
    %15 = arith.addf %12, %14 : vector<32x128xf32>
    %cst_13 = arith.constant 0.000000e+00 : f32
    %16 = vector.broadcast %cst_13 : f32 to vector<32x128xf32>
    %17 = arith.maximumf %15, %16 : vector<32x128xf32>
    %18 = arith.truncf %17 : vector<32x128xf32> to vector<32x128xbf16>
    %c0_14 = arith.constant 0 : index
    %c0_15 = arith.constant 0 : index
    %19 = vector.load %arg7[%c0_14, %c0_15] : memref<32x128xbf16, #tpu.memory_space<vmem>>, vector<32x128xbf16>
    tpu.vector_store %arg7[%c0_14, %c0_15], %18 {strides = array<i32>} : memref<32x128xbf16, #tpu.memory_space<vmem>>, vector<32x128xbf16>,
    return
  }
  func.func @transform_0(%arg0: i32) -> (i32, i32) {
    %c0_i32 = arith.constant 0 : i32
    %c0_i32_0 = arith.constant 0 : i32
    return %arg0, %c0_i32 : i32, i32
  }
  func.func @transform_1(%arg0: i32) -> (i32, i32) {
    %c0_i32 = arith.constant 0 : i32
    %c0_i32_0 = arith.constant 0 : i32
    %c0_i32_1 = arith.constant 0 : i32
    return %c0_i32, %c0_i32_0 : i32, i32
  }
  func.func @transform_2(%arg0: i32) -> (i32, i32) {
    %c0_i32 = arith.constant 0 : i32
    %c0_i32_0 = arith.constant 0 : i32
    %c0_i32_1 = arith.constant 0 : i32
    return %c0_i32, %c0_i32_0 : i32, i32
  }
  func.func @transform_3(%arg0: i32) -> (i32, i32) {
    %c0_i32 = arith.constant 0 : i32
    %c0_i32_0 = arith.constant 0 : i32
    %c0_i32_1 = arith.constant 0 : i32
    return %c0_i32, %c0_i32_0 : i32, i32
  }
  func.func @transform_4(%arg0: i32) -> (i32, i32) {
    %c0_i32 = arith.constant 0 : i32
    %c0_i32_0 = arith.constant 0 : i32
    %c0_i32_1 = arith.constant 0 : i32
    return %c0_i32, %c0_i32_0 : i32, i32
  }
  func.func @transform_5(%arg0: i32) -> (i32, i32) {
    %c0_i32 = arith.constant 0 : i32
    %c0_i32_0 = arith.constant 0 : i32
    return %arg0, %c0_i32 : i32, i32
  }
  func.func @transform_6(%arg0: i32) -> (i32, i32) {
    %c0_i32 = arith.constant 0 : i32
    %c0_i32_0 = arith.constant 0 : i32
    return %arg0, %c0_i32 : i32, i32
  }
}

module attributes {stable_mosaic.version = 11 : i64} {
  func.func @_mm_kernel(%arg0: i32, %arg1: memref<128x288xbf16, #tpu.memory_space<vmem>>, %arg2: memref<288x128xbf16, #tpu.memory_space<vmem>>, %arg3: memref<1x128xf32, #tpu.memory_space<vmem>>, %arg4: memref<128x128xf32, #tpu.memory_space<vmem>>) attributes {dimension_semantics = [#tpu.dimension_semantics<parallel>], iteration_bounds = array<i64: 1>, scalar_prefetch = 0 : i64, scratch_operands = 0 : i64, tpu.core_type = #tpu.core_type<tc>, window_params = [{transform_indices = @transform_0, window_bounds = array<i64: 128, 288>}, {pipeline_mode = #tpu.pipeline_mode<synchronous>, transform_indices = @transform_1, window_bounds = array<i64: 288, 128>}, {pipeline_mode = #tpu.pipeline_mode<synchronous>, transform_indices = @transform_2, window_bounds = array<i64: 1, 128>}, {transform_indices = @transform_3, window_bounds = array<i64: 128, 128>}]} {
    %c0 = arith.constant 0 : index
    %c0_0 = arith.constant 0 : index
    %0 = vector.load %arg1[%c0, %c0_0] : memref<128x288xbf16, #tpu.memory_space<vmem>>, vector<128x288xbf16>
    %c0_1 = arith.constant 0 : index
    %c0_2 = arith.constant 0 : index
    %1 = vector.load %arg2[%c0_1, %c0_2] : memref<288x128xbf16, #tpu.memory_space<vmem>>, vector<288x128xbf16>
    %cst = arith.constant dense<0.000000e+00> : vector<128x128xf32>
    %2 = tpu.matmul %0, %1, %cst {dimension_numbers = #tpu.dot_dimension_numbers<[1], [0], [0], [1], [0, 0, 1, 1], [], []>} : vector<128x288xbf16>, vector<288x128xbf16>, vector<128x128xf32> -> vector<128x128xf32>
    %c0_3 = arith.constant 0 : index
    %c0_4 = arith.constant 0 : index
    %3 = vector.load %arg3[%c0_3, %c0_4] : memref<1x128xf32, #tpu.memory_space<vmem>>, vector<1x128xf32>
    %4 = vector.broadcast %3 : vector<1x128xf32> to vector<128x128xf32>
    %5 = arith.addf %2, %4 : vector<128x128xf32>
    %c0_5 = arith.constant 0 : index
    %c0_6 = arith.constant 0 : index
    %6 = vector.load %arg4[%c0_5, %c0_6] : memref<128x128xf32, #tpu.memory_space<vmem>>, vector<128x128xf32>
    tpu.vector_store %arg4[%c0_5, %c0_6], %5 {strides = array<i32>} : memref<128x128xf32, #tpu.memory_space<vmem>>, vector<128x128xf32>,
    return
  }
  func.func @transform_0(%arg0: i32) -> (i32, i32) {
    %c0_i32 = arith.constant 0 : i32
    %c0_i32_0 = arith.constant 0 : i32
    return %arg0, %c0_i32 : i32, i32
  }
  func.func @transform_1(%arg0: i32) -> (i32, i32) {
    %c0_i32 = arith.constant 0 : i32
    %c0_i32_0 = arith.constant 0 : i32
    %c0_i32_1 = arith.constant 0 : i32
    return %c0_i32, %c0_i32_0 : i32, i32
  }
  func.func @transform_2(%arg0: i32) -> (i32, i32) {
    %c0_i32 = arith.constant 0 : i32
    %c0_i32_0 = arith.constant 0 : i32
    %c0_i32_1 = arith.constant 0 : i32
    return %c0_i32, %c0_i32_0 : i32, i32
  }
  func.func @transform_3(%arg0: i32) -> (i32, i32) {
    %c0_i32 = arith.constant 0 : i32
    %c0_i32_0 = arith.constant 0 : i32
    return %arg0, %c0_i32 : i32, i32
  }
}

</mosaic_0001>

<bundles_post_ra>
// kernel: vqvae_forward.8
= control target key start
LH: loop header
LB: loop body
LE: loop exit
PB: predicated region body
PF: predicated region fallthrough
CT: control target
= control target key end

     0   :  { %vm110_vm0 = vcmask 523264   ;;  %s579_s1 = inlined_call_operand.vmem [shape: bf16[64,128], index: 1, kind: input, shape index: {}]   ;;  %s580_s0 = inlined_call_operand.vmem [shape: bf16[128,64], index: 0, kind: input, shape index: {}]   ;;  %s581_s2 = inlined_call_operand.vmem [shape: f32[1,128], index: 2, kind: input, shape index: {}]   ;;  %s582_s3 = inlined_call_operand.vmem [shape: bf16[128,128], index: 3, kind: output, shape index: {}]  }
   0x1   :  { %v476_v0 = vld [vmem:[%s579_s1] sm:$0xff]   ;;  %v477_v1 = vld [vmem:[%s579_s1 + $0x8] sm:$0xff]   ;;  %v478_v2 = vld [vmem:[%s579_s1 + $0x10] sm:$0xff]  }
   0x2   :  { %444 = vmatprep.subr.bf16.mxu0 %v476_v0  ;;  %468 = vmatprep.subr.bf16.mxu1 %v476_v0  ;;  %v480_v3 = vld [vmem:[%s580_s0] sm:$0xff]   ;;  %v479_v5 = vld [vmem:[%s579_s1 + $0x18] sm:$0xff]   ;;  %v482_v6 = vld [vmem:[%s580_s0 + $0x8] sm:$0xff]  }
   0x3   :  { %445 = vmatpush3.bf16.msra.mxu0 %v476_v0  ;;  %472 = vmatpush3.bf16.msra.mxu1 %v476_v0  ;;  %v481_v4 = vld [vmem:[%s580_s0 + $0x20] sm:$0xff]   ;;  %v483_v7 = vld [vmem:[%s580_s0 + $0x28] sm:$0xff]   ;;  %v484_v8 = vld [vmem:[%s580_s0 + $0x10] sm:$0xff]  }
   0x4   :  { %446 = vmatprep.subr.bf16.mxu0 %v477_v1  ;;  %469 = vmatprep.subr.bf16.mxu1 %v477_v1  ;;  %v485_v9 = vld [vmem:[%s580_s0 + $0x30] sm:$0xff]   ;;  %v486_v10 = vld [vmem:[%s580_s0 + $0x18] sm:$0xff]   ;;  %v332_v12 = vld [vmem:[%s581_s2] ss:$0 sm:$0xff] }
   0x5   :  { %452 = vmatprep.mubr.msk.bf16.mxu0 %vm110_vm0, %v480_v3  ;;  %460 = vmatprep.mubr.msk.bf16.mxu1 %vm110_vm0, %v481_v4  ;;  %v487_v11 = vld [vmem:[%s580_s0 + $0x38] sm:$0xff]  }
   0x7   :  { %447 = vmatpush3.bf16.msra.mxu0 %v477_v1  ;;  %473 = vmatpush3.bf16.msra.mxu1 %v477_v1 }
   0x8   :  { %448 = vmatprep.subr.bf16.mxu0 %v478_v2  ;;  %470 = vmatprep.subr.bf16.mxu1 %v478_v2 }
   0xb   :  { %449 = vmatpush3.bf16.msra.mxu0 %v478_v2  ;;  %474 = vmatpush3.bf16.msra.mxu1 %v478_v2 }
   0xc   :  { %450 = vmatprep.subr.bf16.mxu0 %v479_v5  ;;  %471 = vmatprep.subr.bf16.mxu1 %v479_v5 }
   0xf   :  { %451 = vmatpush3.bf16.msra.mxu0 %v479_v5  ;;  %475 = vmatpush3.bf16.msra.mxu1 %v479_v5 }
  0x12   :  { %453 = vmatmul.mubr.msk.bf16.vlgmr.msra.gmra.mrb[0].mxu0 %vm110_vm0, %v482_v6  ;;  %461 = vmatmul.mubr.msk.bf16.vlgmr.msra.gmra.mrb[0].mxu1 %vm110_vm0, %v483_v7 }
  0x13   :  { %456 = vmatprep.mubr.msk.bf16.mxu0 %vm110_vm0, %v484_v8  ;;  %464 = vmatprep.mubr.msk.bf16.mxu1 %vm110_vm0, %v485_v9 }
  0x1a   :  { %457 = vmatmul.mubr.msk.bf16.gmra.mrb[4].mxu0 %vm110_vm0, %v486_v10  ;;  %465 = vmatmul.mubr.msk.bf16.gmra.mrb[4].mxu1 %vm110_vm0, %v487_v11 }
  0xe5   :  { %v454_v13 = vpop.f32.mrb[0].mxu0  ;;  %v462_v14 = vpop.f32.mrb[0].mxu1 }
  0xe6   :  { %v178_v15 = vadd.f32 %v454_v13, %v332_v12  ;;  %v210_v16 = vadd.f32 %v462_v14, %v332_v12  ;;  %v169_v17 = vpop.f32.mrb[1].mxu0  ;;  %v201_v18 = vpop.f32.mrb[1].mxu1 }
  0xe7   :  { %v170_v19 = vadd.f32 %v332_v12, %v169_v17  ;;  %v202_v20 = vadd.f32 %v332_v12, %v201_v18  ;;  %v455_v21 = vpop.f32.mrb[2].mxu0  ;;  %v463_v22 = vpop.f32.mrb[2].mxu1 }
  0xe8   :  { %v181_v23 = vadd.f32 %v455_v21, %v332_v12  ;;  %v213_v24 = vadd.f32 %v463_v22, %v332_v12  ;;  %v172_v25 = vpop.f32.mrb[3].mxu0  ;;  %v204_v26 = vpop.f32.mrb[3].mxu1  ;;  %v234_v29 = vmax.f32 %v178_v15, 0.0  ;;  %v242_v30 = vmax.f32 %v210_v16, 0.0 }
  0xe9   :  { %v173_v27 = vadd.f32 %v332_v12, %v172_v25  ;;  %v205_v28 = vadd.f32 %v332_v12, %v204_v26  ;;  %v232_v33 = vmax.f32 %v170_v19, 0.0  ;;  %v240_v34 = vmax.f32 %v202_v20, 0.0 }
  0xea   :  { %v235_v31 = vmax.f32 %v181_v23, 0.0  ;;  %v243_v32 = vmax.f32 %v213_v24, 0.0 }
  0xeb   :  { %v233_v35 = vmax.f32 %v173_v27, 0.0  ;;  %v241_v36 = vmax.f32 %v205_v28, 0.0 }
  0xec   :  { %v393_v37 = vpack.c.bf16 %v235_v31, %v234_v29  ;;  %v413_v38 = vpack.c.bf16 %v243_v32, %v242_v30 }
  0xed   :  { %v388_v39 = vpack.c.bf16 %v233_v35, %v232_v33  ;;  %v408_v40 = vpack.c.bf16 %v241_v36, %v240_v34  ;;  %v458_v41 = vpop.f32.mrb[4].mxu0  ;;  %v466_v42 = vpop.f32.mrb[4].mxu1 }
  0xee   :  { %425 = vst [vmem:[%s582_s3 + $0x8] sm:$0xff] %v393_v37   ;;  %429 = vst [vmem:[%s582_s3 + $0x28] sm:$0xff] %v413_v38   ;;  %v194_v43 = vadd.f32 %v458_v41, %v332_v12  ;;  %v226_v44 = vadd.f32 %v466_v42, %v332_v12  ;;  %v185_v45 = vpop.f32.mrb[5].mxu0  ;;  %v217_v46 = vpop.f32.mrb[5].mxu1 }
  0xef   :  { %389 = vst [vmem:[%s582_s3] sm:$0xff] %v388_v39   ;;  %428 = vst [vmem:[%s582_s3 + $0x20] sm:$0xff] %v408_v40   ;;  %v186_v47 = vadd.f32 %v332_v12, %v185_v45  ;;  %v218_v48 = vadd.f32 %v332_v12, %v217_v46  ;;  %v459_v49 = vpop.f32.mrb[6].mxu0  ;;  %v467_v50 = vpop.f32.mrb[6].mxu1 }
  0xf0   :  { %v197_v51 = vadd.f32 %v459_v49, %v332_v12  ;;  %v229_v52 = vadd.f32 %v467_v50, %v332_v12  ;;  %v188_v53 = vpop.f32.mrb[7].mxu0  ;;  %v220_v54 = vpop.f32.mrb[7].mxu1  ;;  %v238_v57 = vmax.f32 %v194_v43, 0.0  ;;  %v246_v58 = vmax.f32 %v226_v44, 0.0 }
  0xf1   :  { %v189_v55 = vadd.f32 %v332_v12, %v188_v53  ;;  %v221_v56 = vadd.f32 %v332_v12, %v220_v54  ;;  %v236_v61 = vmax.f32 %v186_v47, 0.0  ;;  %v244_v62 = vmax.f32 %v218_v48, 0.0 }
  0xf2   :  { %v239_v59 = vmax.f32 %v197_v51, 0.0  ;;  %v247_v60 = vmax.f32 %v229_v52, 0.0 }
  0xf3   :  { %v237_v63 = vmax.f32 %v189_v55, 0.0  ;;  %v245_v0 = vmax.f32 %v221_v56, 0.0 }
  0xf4   :  { %v403_v1 = vpack.c.bf16 %v239_v59, %v238_v57  ;;  %v423_v2 = vpack.c.bf16 %v247_v60, %v246_v58 }
  0xf5   :  { %v398_v3 = vpack.c.bf16 %v237_v63, %v236_v61  ;;  %v418_v4 = vpack.c.bf16 %v245_v0, %v244_v62 }
  0xf6   :  { %427 = vst [vmem:[%s582_s3 + $0x18] sm:$0xff] %v403_v1   ;;  %431 = vst [vmem:[%s582_s3 + $0x38] sm:$0xff] %v423_v2  }
  0xf7   :  { %426 = vst [vmem:[%s582_s3 + $0x10] sm:$0xff] %v398_v3   ;;  %430 = vst [vmem:[%s582_s3 + $0x30] sm:$0xff] %v418_v4  }

// kernel: vqvae_forward.9
= control target key start
LH: loop header
LB: loop body
LE: loop exit
PB: predicated region body
PF: predicated region fallthrough
CT: control target
= control target key end

     0   :  { %s728_s1 = inlined_call_operand.vmem [shape: bf16[512,128], index: 1, kind: input, shape index: {}]   ;;  %s729_s0 = inlined_call_operand.vmem [shape: bf16[32,512], index: 0, kind: input, shape index: {}]   ;;  %s730_s2 = inlined_call_operand.vmem [shape: f32[1,128], index: 2, kind: input, shape index: {}]   ;;  %s731_s3 = inlined_call_operand.vmem [shape: f32[32,128], index: 3, kind: output, shape index: {}]  }
   0x1   :  { %v529_v0 = vld [vmem:[%s728_s1 + $0x40] sm:$0xff]   ;;  %v533_v4 = vld [vmem:[%s728_s1 + $0x48] sm:$0xff]   ;;  %v537_v8 = vld [vmem:[%s728_s1 + $0x50] sm:$0xff]  }
   0x2   :  { %v530_v1 = vld [vmem:[%s728_s1 + $0xc0] sm:$0xff]   ;;  %473 = vmatprep.subr.bf16.mxu0 %v529_v0  ;;  %v534_v5 = vld [vmem:[%s728_s1 + $0xc8] sm:$0xff]   ;;  %v538_v9 = vld [vmem:[%s728_s1 + $0xd0] sm:$0xff]  }
   0x3   :  { %v531_v2 = vld [vmem:[%s728_s1] sm:$0xff]   ;;  %501 = vmatprep.subr.bf16.mxu1 %v530_v1  ;;  %v535_v6 = vld [vmem:[%s728_s1 + $0x8] sm:$0xff]   ;;  %v539_v10 = vld [vmem:[%s728_s1 + $0x10] sm:$0xff]  }
   0x4   :  { %v532_v3 = vld [vmem:[%s728_s1 + $0x80] sm:$0xff]   ;;  %474 = vmatpush3.bf16.msra.mxu0 %v531_v2  ;;  %v536_v7 = vld [vmem:[%s728_s1 + $0x88] sm:$0xff]   ;;  %v540_v11 = vld [vmem:[%s728_s1 + $0x90] sm:$0xff]  }
   0x5   :  { %502 = vmatpush3.bf16.msra.mxu1 %v532_v3  ;;  %475 = vmatprep.subr.bf16.mxu0 %v533_v4  ;;  %v541_v12 = vld [vmem:[%s728_s1 + $0x58] sm:$0xff]   ;;  %v545_v16 = vld [vmem:[%s728_s1 + $0x60] sm:$0xff]   ;;  %v549_v20 = vld [vmem:[%s728_s1 + $0x68] sm:$0xff]  }
   0x6   :  { %503 = vmatprep.subr.bf16.mxu1 %v534_v5  ;;  %v542_v13 = vld [vmem:[%s728_s1 + $0xd8] sm:$0xff]   ;;  %v546_v17 = vld [vmem:[%s728_s1 + $0xe0] sm:$0xff]   ;;  %v550_v21 = vld [vmem:[%s728_s1 + $0xe8] sm:$0xff]  }
   0x7   :  { %v543_v14 = vld [vmem:[%s728_s1 + $0x18] sm:$0xff]   ;;  %v547_v18 = vld [vmem:[%s728_s1 + $0x20] sm:$0xff]   ;;  %v551_v22 = vld [vmem:[%s728_s1 + $0x28] sm:$0xff]  }
   0x8   :  { %476 = vmatpush3.bf16.msra.mxu0 %v535_v6  ;;  %v544_v15 = vld [vmem:[%s728_s1 + $0x98] sm:$0xff]   ;;  %v548_v19 = vld [vmem:[%s728_s1 + $0xa0] sm:$0xff]   ;;  %v552_v23 = vld [vmem:[%s728_s1 + $0xa8] sm:$0xff]  }
   0x9   :  { %504 = vmatpush3.bf16.msra.mxu1 %v536_v7  ;;  %477 = vmatprep.subr.bf16.mxu0 %v537_v8  ;;  %v553_v24 = vld [vmem:[%s728_s1 + $0x70] sm:$0xff]   ;;  %v557_v28 = vld [vmem:[%s728_s1 + $0x78] sm:$0xff]   ;;  %v432_v42 = vld [vmem:[%s730_s2] ss:$0 sm:$0xff] }
   0xa   :  { %505 = vmatprep.subr.bf16.mxu1 %v538_v9  ;;  %v554_v25 = vld [vmem:[%s728_s1 + $0xf0] sm:$0xff]   ;;  %v558_v29 = vld [vmem:[%s728_s1 + $0xf8] sm:$0xff]  }
   0xb   :  { %v555_v26 = vld [vmem:[%s728_s1 + $0x30] sm:$0xff]   ;;  %v559_v30 = vld [vmem:[%s728_s1 + $0x38] sm:$0xff]  }
   0xc   :  { %478 = vmatpush3.bf16.msra.mxu0 %v539_v10  ;;  %v556_v27 = vld [vmem:[%s728_s1 + $0xb0] sm:$0xff]   ;;  %v560_v31 = vld [vmem:[%s728_s1 + $0xb8] sm:$0xff]  }
   0xd   :  { %506 = vmatpush3.bf16.msra.mxu1 %v540_v11  ;;  %479 = vmatprep.subr.bf16.mxu0 %v541_v12  ;;  %v561_v32 = vld [vmem:[%s729_s0] ss:$16 sps:$4 sm:$0xff]   ;;  %v563_v33 = vld [vmem:[%s729_s0 + $0x4] ss:$16 sps:$4 sm:$0xff]   ;;  %v564_v34 = vld [vmem:[%s729_s0 + $0x8] ss:$16 sps:$4 sm:$0xff]  }
   0xe   :  { %507 = vmatprep.subr.bf16.mxu1 %v542_v13  ;;  %v566_v35 = vld [vmem:[%s729_s0 + $0xc] ss:$16 sps:$4 sm:$0xff]   ;;  %358 = vmatprep.mubr.bf16.mxu0 %v563_v33  ;;  %v567_v36 = vld [vmem:[%s729_s0 + $0x24] ss:$16 sps:$4 sm:$0xff]   ;;  %v571_v38 = vld [vmem:[%s729_s0 + $0x20] ss:$16 sps:$4 sm:$0xff]  }
   0xf   :  { %407 = vmatprep.mubr.bf16.mxu1 %v566_v35  ;;  %v569_v37 = vld [vmem:[%s729_s0 + $0x2c] ss:$16 sps:$4 sm:$0xff]   ;;  %v572_v39 = vld [vmem:[%s729_s0 + $0x28] ss:$16 sps:$4 sm:$0xff]  }
  0x10   :  { %480 = vmatpush3.bf16.msra.mxu0 %v543_v14 }
  0x11   :  { %508 = vmatpush3.bf16.msra.mxu1 %v544_v15  ;;  %481 = vmatprep.subr.bf16.mxu0 %v545_v16 }
  0x12   :  { %509 = vmatprep.subr.bf16.mxu1 %v546_v17 }
  0x14   :  { %482 = vmatpush3.bf16.msra.mxu0 %v547_v18 }
  0x15   :  { %510 = vmatpush3.bf16.msra.mxu1 %v548_v19  ;;  %483 = vmatprep.subr.bf16.mxu0 %v549_v20 }
  0x16   :  { %511 = vmatprep.subr.bf16.mxu1 %v550_v21 }
  0x18   :  { %484 = vmatpush3.bf16.msra.mxu0 %v551_v22 }
  0x19   :  { %512 = vmatpush3.bf16.msra.mxu1 %v552_v23  ;;  %485 = vmatprep.subr.bf16.mxu0 %v553_v24 }
  0x1a   :  { %513 = vmatprep.subr.bf16.mxu1 %v554_v25 }
  0x1c   :  { %486 = vmatpush3.bf16.msra.mxu0 %v555_v26 }
  0x1d   :  { %514 = vmatpush3.bf16.msra.mxu1 %v556_v27  ;;  %487 = vmatprep.subr.bf16.mxu0 %v557_v28 }
  0x1e   :  { %515 = vmatprep.subr.bf16.mxu1 %v558_v29 }
  0x20   :  { %488 = vmatpush3.bf16.msra.mxu0 %v559_v30 }
  0x21   :  { %516 = vmatpush3.bf16.msra.mxu1 %v560_v31 }
  0x23   :  { %359 = vmatmul.mubr.bf16.vlgmr.msra.gmra.mrb[0].mxu0 %v561_v32 }
  0x24   :  { %408 = vmatmul.mubr.bf16.vlgmr.msra.gmra.mrb[0].mxu1 %v564_v34  ;;  %366 = vmatprep.mubr.bf16.mxu0 %v567_v36 }
  0x25   :  { %415 = vmatprep.mubr.bf16.mxu1 %v569_v37 }
  0x2b   :  { %367 = vmatmul.mubr.bf16.gmra.mrb[4].mxu0 %v571_v38 }
  0x2c   :  { %416 = vmatmul.mubr.bf16.gmra.mrb[4].mxu1 %v572_v39 }
  0xf6   :  { %v489_v40 = vpop.f32.mrb[0].mxu0 }
  0xf7   :  { %v517_v41 = vpop.f32.mrb[0].mxu1  ;;  %v490_v43 = vpop.f32.mrb[1].mxu0 }
  0xf8   :  { %v491_v44 = vadd.f32 %v490_v43, %v489_v40  ;;  %v518_v45 = vpop.f32.mrb[1].mxu1  ;;  %v492_v46 = vpop.f32.mrb[2].mxu0 }
  0xf9   :  { %v519_v47 = vadd.f32 %v518_v45, %v517_v41  ;;  %v520_v48 = vpop.f32.mrb[2].mxu1  ;;  %v493_v49 = vpop.f32.mrb[3].mxu0 }
  0xfa   :  { %v361_v50 = vadd.f32 %v491_v44, %v432_v42  ;;  %v494_v51 = vadd.f32 %v493_v49, %v492_v46  ;;  %v521_v52 = vpop.f32.mrb[3].mxu1 }
  0xfb   :  { %v522_v53 = vadd.f32 %v521_v52, %v520_v48 }
  0xfc   :  { %v410_v54 = vadd.f32 %v519_v47, %v361_v50  ;;  %v364_v55 = vadd.f32 %v494_v51, %v432_v42 }
  0xfe   :  { %424 = vst [vmem:[%s731_s3] sm:$0xff] %v410_v54  ;;  %v413_v56 = vadd.f32 %v522_v53, %v364_v55  ;;  %v495_v57 = vpop.f32.mrb[4].mxu0 }
  0xff   :  { %v523_v58 = vpop.f32.mrb[4].mxu1  ;;  %v496_v59 = vpop.f32.mrb[5].mxu0 }
 0x100   :  { %425 = vst [vmem:[%s731_s3 + $0x8] sm:$0xff] %v413_v56  ;;  %v497_v60 = vadd.f32 %v496_v59, %v495_v57  ;;  %v524_v61 = vpop.f32.mrb[5].mxu1  ;;  %v498_v62 = vpop.f32.mrb[6].mxu0 }
 0x101   :  { %v525_v63 = vadd.f32 %v524_v61, %v523_v58  ;;  %v526_v0 = vpop.f32.mrb[6].mxu1  ;;  %v499_v1 = vpop.f32.mrb[7].mxu0 }
 0x102   :  { %v369_v2 = vadd.f32 %v497_v60, %v432_v42  ;;  %v500_v3 = vadd.f32 %v499_v1, %v498_v62  ;;  %v527_v4 = vpop.f32.mrb[7].mxu1 }
 0x103   :  { %v528_v5 = vadd.f32 %v527_v4, %v526_v0 }
 0x104   :  { %v418_v6 = vadd.f32 %v525_v63, %v369_v2  ;;  %v372_v7 = vadd.f32 %v500_v3, %v432_v42 }
 0x106   :  { %426 = vst [vmem:[%s731_s3 + $0x10] sm:$0xff] %v418_v6  ;;  %v421_v8 = vadd.f32 %v528_v5, %v372_v7 }
 0x108   :  { %427 = vst [vmem:[%s731_s3 + $0x18] sm:$0xff] %v421_v8 }

// kernel: vqvae_forward.10
= control target key start
LH: loop header
LB: loop body
LE: loop exit
PB: predicated region body
PF: predicated region fallthrough
CT: control target
= control target key end

     0   :  { %vm213_vm0 = vcmask 261120   ;;  %s767_s1 = inlined_call_operand.vmem [shape: bf16[288,128], index: 1, kind: input, shape index: {}]   ;;  %s768_s0 = inlined_call_operand.vmem [shape: bf16[32,288], index: 0, kind: input, shape index: {}]   ;;  %s769_s3 = inlined_call_operand.vmem [shape: bf16[128,128], index: 3, kind: input, shape index: {}]   ;;  %s770_s2 = inlined_call_operand.vmem [shape: f32[1,128], index: 2, kind: input, shape index: {}]   ;;  %s771_s5 = inlined_call_operand.vmem [shape: f32[32,128], index: 5, kind: input, shape index: {}]   ;;  %s772_s4 = inlined_call_operand.vmem [shape: f32[1,128], index: 4, kind: input, shape index: {}]   ;;  %s773_s6 = inlined_call_operand.vmem [shape: f32[32,128], index: 6, kind: output, shape index: {}]  }
   0x1   :  { %v570_v0 = vld [vmem:[%s767_s1 + $0x40] sm:$0xff]   ;;  %v572_v2 = vld [vmem:[%s767_s1 + $0x48] sm:$0xff]   ;;  %v574_v4 = vld [vmem:[%s767_s1 + $0x50] sm:$0xff]  }
   0x2   :  { %v571_v1 = vld [vmem:[%s767_s1] sm:$0xff]   ;;  %500 = vmatprep.subr.bf16.mxu0 %v570_v0  ;;  %v573_v3 = vld [vmem:[%s767_s1 + $0x8] sm:$0xff]   ;;  %v575_v5 = vld [vmem:[%s767_s1 + $0x10] sm:$0xff]  }
   0x3   :  { %501 = vmatpush3.bf16.msra.mxu0 %v571_v1  ;;  %v576_v6 = vld [vmem:[%s767_s1 + $0x58] sm:$0xff]   ;;  %v578_v8 = vld [vmem:[%s767_s1 + $0x60] sm:$0xff]   ;;  %v580_v11 = vld [vmem:[%s767_s1 + $0x68] sm:$0xff]  }
   0x4   :  { %502 = vmatprep.subr.bf16.mxu0 %v572_v2  ;;  %v577_v7 = vld [vmem:[%s767_s1 + $0x18] sm:$0xff]   ;;  %v579_v9 = vld [vmem:[%s767_s1 + $0x20] sm:$0xff]   ;;  %v581_v12 = vld [vmem:[%s767_s1 + $0x28] sm:$0xff]  }
   0x5   :  { %v585_v10 = vld [vmem:[%s767_s1 + $0x80] sm:$0xff]   ;;  %v582_v13 = vld [vmem:[%s767_s1 + $0x70] sm:$0xff]   ;;  %v590_v15 = vld [vmem:[%s767_s1 + $0x88] sm:$0xff]  }
   0x6   :  { %542 = vmatprep.subr.bf16.mxu1 %v585_v10  ;;  %v589_v14 = vld [vmem:[%s768_s0 + $0x4] ss:$12 sps:$4 sm:$0xff]   ;;  %v591_v16 = vld [vmem:[%s768_s0 + $0x8] ss:$12 sps:$4 sm:$0xff]   ;;  %v592_v17 = vld [vmem:[%s768_s0 + $0x20] ss:$12 sps:$4 sm:$0xff]  }
   0x7   :  { %503 = vmatpush3.bf16.msra.mxu0 %v573_v3  ;;  %543 = vmatpush3.bf16.msra.mxu1 %v585_v10  ;;  %v583_v18 = vld [vmem:[%s767_s1 + $0x30] sm:$0xff]   ;;  %v584_v19 = vld [vmem:[%s767_s1 + $0x78] sm:$0xff]   ;;  %v596_v20 = vld [vmem:[%s769_s3] sm:$0xff]  }
   0x8   :  { %504 = vmatprep.subr.bf16.mxu0 %v574_v4  ;;  %252 = vmatprep.mubr.bf16.mxu0 %v589_v14  ;;  %v597_v21 = vld [vmem:[%s769_s3 + $0x8] sm:$0xff]   ;;  %v586_v22 = vld [vmem:[%s767_s1 + $0x38] sm:$0xff]   ;;  %v598_v23 = vld [vmem:[%s769_s3 + $0x10] sm:$0xff]  }
   0x9   :  { %544 = vmatprep.subr.bf16.mxu1 %v590_v15  ;;  %546 = vmatprep.mubr.msk.bf16.mxu1 %vm213_vm0, %v591_v16  ;;  %v587_v24 = vld [vmem:[%s768_s0] ss:$12 sps:$4 sm:$0xff]   ;;  %v593_v25 = vld [vmem:[%s768_s0 + $0x1c] ss:$12 sps:$4 sm:$0xff]   ;;  %v595_v26 = vld [vmem:[%s768_s0 + $0x18] ss:$12 sps:$4 sm:$0xff]  }
   0xa   :  { %v599_v27 = vld [vmem:[%s769_s3 + $0x18] sm:$0xff]   ;;  %v600_v28 = vld [vmem:[%s769_s3 + $0x20] sm:$0xff]   ;;  %v601_v29 = vld [vmem:[%s769_s3 + $0x28] sm:$0xff]  }
   0xb   :  { %505 = vmatpush3.bf16.msra.mxu0 %v575_v5  ;;  %545 = vmatpush3.bf16.msra.mxu1 %v590_v15  ;;  %v602_v30 = vld [vmem:[%s769_s3 + $0x30] sm:$0xff]   ;;  %v603_v31 = vld [vmem:[%s769_s3 + $0x38] sm:$0xff]   ;;  %v464_v38 = vld [vmem:[%s770_s2] ss:$0 sm:$0xff] }
   0xc   :  { %506 = vmatprep.subr.bf16.mxu0 %v576_v6  ;;  %550 = vmatprep.subr.bf16.mxu1 %v596_v20  ;;  %v439_v63 = vld [vmem:[%s771_s5 + $0x10] sm:$0xff]  ;;  %v437_v0 = vld [vmem:[%s771_s5] sm:$0xff]  ;;  %v440_v3 = vld [vmem:[%s771_s5 + $0x18] sm:$0xff] }
   0xd   :  { %v499_v2 = vld [vmem:[%s772_s4] ss:$0 sm:$0xff]  ;;  %v438_v6 = vld [vmem:[%s771_s5 + $0x8] sm:$0xff] }
   0xe   :  { %547 = vmatmul.mubr.msk.bf16.vlgmr.msra.gmra.mrb[0].mxu1 %vm213_vm0, %v592_v17 }
   0xf   :  { %507 = vmatpush3.bf16.msra.mxu0 %v577_v7  ;;  %551 = vmatpush3.bf16.msra.mxu1 %v596_v20 }
  0x10   :  { %508 = vmatprep.subr.bf16.mxu0 %v578_v8  ;;  %552 = vmatprep.subr.bf16.mxu1 %v597_v21 }
  0x13   :  { %509 = vmatpush3.bf16.msra.mxu0 %v579_v9  ;;  %553 = vmatpush3.bf16.msra.mxu1 %v597_v21 }
  0x14   :  { %510 = vmatprep.subr.bf16.mxu0 %v580_v11  ;;  %554 = vmatprep.subr.bf16.mxu1 %v598_v23 }
  0x17   :  { %511 = vmatpush3.bf16.msra.mxu0 %v581_v12  ;;  %555 = vmatpush3.bf16.msra.mxu1 %v598_v23 }
  0x18   :  { %512 = vmatprep.subr.bf16.mxu0 %v582_v13  ;;  %556 = vmatprep.subr.bf16.mxu1 %v599_v27 }
  0x1b   :  { %513 = vmatpush3.bf16.msra.mxu0 %v583_v18  ;;  %557 = vmatpush3.bf16.msra.mxu1 %v599_v27 }
  0x1c   :  { %514 = vmatprep.subr.bf16.mxu0 %v584_v19  ;;  %558 = vmatprep.subr.bf16.mxu1 %v600_v28 }
  0x1f   :  { %515 = vmatpush3.bf16.msra.mxu0 %v586_v22  ;;  %559 = vmatpush3.bf16.msra.mxu1 %v600_v28 }
  0x20   :  { %560 = vmatprep.subr.bf16.mxu1 %v601_v29 }
  0x22   :  { %253 = vmatmul.mubr.bf16.vlgmr.msra.gmra.mrb[0].mxu0 %v587_v24 }
  0x23   :  { %260 = vmatprep.mubr.bf16.mxu0 %v593_v25  ;;  %561 = vmatpush3.bf16.msra.mxu1 %v601_v29 }
  0x24   :  { %562 = vmatprep.subr.bf16.mxu1 %v602_v30 }
  0x27   :  { %563 = vmatpush3.bf16.msra.mxu1 %v602_v30 }
  0x28   :  { %564 = vmatprep.subr.bf16.mxu1 %v603_v31 }
  0x2a   :  { %261 = vmatmul.mubr.bf16.gmra.mrb[4].mxu0 %v595_v26 }
  0x2b   :  { %565 = vmatpush3.bf16.msra.mxu1 %v603_v31 }
  0xe1   :  { %v548_v32 = vpop.f32.mrb[0].mxu1 }
  0xe2   :  { %v303_v33 = vpop.f32.mrb[1].mxu1 }
  0xe3   :  { %v549_v34 = vpop.f32.mrb[2].mxu1 }
  0xe4   :  { %v306_v35 = vpop.f32.mrb[3].mxu1 }
  0xf5   :  { %v516_v36 = vpop.f32.mrb[0].mxu0 }
  0xf6   :  { %v517_v37 = vpop.f32.mrb[1].mxu0 }
  0xf7   :  { %v518_v39 = vadd.f32 %v517_v37, %v516_v36  ;;  %v519_v40 = vpop.f32.mrb[2].mxu0 }
  0xf8   :  { %v520_v41 = vpop.f32.mrb[3].mxu0 }
  0xf9   :  { %v521_v42 = vadd.f32 %v520_v41, %v519_v40  ;;  %v255_v43 = vadd.f32 %v518_v39, %v464_v38 }
  0xfb   :  { %v304_v44 = vadd.f32 %v303_v33, %v255_v43  ;;  %v258_v45 = vadd.f32 %v521_v42, %v464_v38 }
  0xfd   :  { %v307_v46 = vadd.f32 %v306_v35, %v258_v45  ;;  %v522_v47 = vpop.f32.mrb[4].mxu0  ;;  %v318_v49 = vmax.f32 %v304_v44, 0.0 }
  0xfe   :  { %v523_v48 = vpop.f32.mrb[5].mxu0 }
  0xff   :  { %v319_v50 = vmax.f32 %v307_v46, 0.0  ;;  %v524_v51 = vadd.f32 %v523_v48, %v522_v47  ;;  %v525_v52 = vpop.f32.mrb[6].mxu0 }
 0x100   :  { %v526_v53 = vpop.f32.mrb[7].mxu0 }
 0x101   :  { %v322_v54 = vpack.c.bf16 %v319_v50, %v318_v49  ;;  %v263_v55 = vadd.f32 %v524_v51, %v464_v38  ;;  %v527_v56 = vadd.f32 %v526_v53, %v525_v52 }
 0x103   :  { %v312_v57 = vadd.f32 %v548_v32, %v263_v55  ;;  %v266_v58 = vadd.f32 %v527_v56, %v464_v38  ;;  %566 = vmatprep.mubr.bf16.mxu1 %v322_v54 }
 0x105   :  { %v315_v59 = vadd.f32 %v549_v34, %v266_v58  ;;  %v320_v60 = vmax.f32 %v312_v57, 0.0 }
 0x107   :  { %v321_v61 = vmax.f32 %v315_v59, 0.0 }
 0x109   :  { %v323_v62 = vpack.c.bf16 %v321_v61, %v320_v60 }
 0x10b   :  { %567 = vmatmul.mubr.bf16.vlgmr.msra.gmra.mrb[4].mxu1 %v323_v62 }
 0x1de   :  { %v568_v1 = vpop.f32.mrb[4].mxu1 }
 0x1df   :  { %v443_v4 = vadd.f32 %v568_v1, %v439_v63  ;;  %v422_v5 = vpop.f32.mrb[5].mxu1 }
 0x1e0   :  { %v441_v7 = vadd.f32 %v437_v0, %v422_v5  ;;  %v569_v8 = vpop.f32.mrb[6].mxu1 }
 0x1e1   :  { %v454_v9 = vadd.f32 %v499_v2, %v443_v4  ;;  %v444_v10 = vadd.f32 %v569_v8, %v440_v3  ;;  %v425_v11 = vpop.f32.mrb[7].mxu1 }
 0x1e2   :  { %v452_v12 = vadd.f32 %v499_v2, %v441_v7  ;;  %v442_v13 = vadd.f32 %v438_v6, %v425_v11 }
 0x1e3   :  { %458 = vst [vmem:[%s773_s6 + $0x10] sm:$0xff] %v454_v9  ;;  %v455_v14 = vadd.f32 %v499_v2, %v444_v10 }
 0x1e4   :  { %456 = vst [vmem:[%s773_s6] sm:$0xff] %v452_v12  ;;  %v453_v15 = vadd.f32 %v499_v2, %v442_v13 }
 0x1e5   :  { %459 = vst [vmem:[%s773_s6 + $0x18] sm:$0xff] %v455_v14 }
 0x1e6   :  { %457 = vst [vmem:[%s773_s6 + $0x8] sm:$0xff] %v453_v15 }

// kernel: vqvae_forward.14
= control target key start
LH: loop header
LB: loop body
LE: loop exit
PB: predicated region body
PF: predicated region fallthrough
CT: control target
= control target key end

     0   :  { %vm204_vm0 = vcmask 261120   ;;  %s550_s1 = inlined_call_operand.vmem [shape: bf16[288,128], index: 1, kind: input, shape index: {}]   ;;  %s551_s0 = inlined_call_operand.vmem [shape: bf16[32,288], index: 0, kind: input, shape index: {}]   ;;  %s552_s2 = inlined_call_operand.vmem [shape: f32[1,128], index: 2, kind: input, shape index: {}]   ;;  %s553_s3 = inlined_call_operand.vmem [shape: bf16[32,128], index: 3, kind: output, shape index: {}]  }
   0x1   :  { %v423_v0 = vld [vmem:[%s550_s1 + $0x40] sm:$0xff]   ;;  %v425_v2 = vld [vmem:[%s550_s1 + $0x48] sm:$0xff]   ;;  %v427_v4 = vld [vmem:[%s550_s1 + $0x50] sm:$0xff]  }
   0x2   :  { %v424_v1 = vld [vmem:[%s550_s1] sm:$0xff]   ;;  %383 = vmatprep.subr.bf16.mxu0 %v423_v0  ;;  %v426_v3 = vld [vmem:[%s550_s1 + $0x8] sm:$0xff]   ;;  %v428_v5 = vld [vmem:[%s550_s1 + $0x10] sm:$0xff]  }
   0x3   :  { %384 = vmatpush3.bf16.msra.mxu0 %v424_v1  ;;  %v429_v6 = vld [vmem:[%s550_s1 + $0x58] sm:$0xff]   ;;  %v431_v8 = vld [vmem:[%s550_s1 + $0x60] sm:$0xff]   ;;  %v433_v11 = vld [vmem:[%s550_s1 + $0x68] sm:$0xff]  }
   0x4   :  { %385 = vmatprep.subr.bf16.mxu0 %v425_v2  ;;  %v430_v7 = vld [vmem:[%s550_s1 + $0x18] sm:$0xff]   ;;  %v432_v9 = vld [vmem:[%s550_s1 + $0x20] sm:$0xff]   ;;  %v434_v12 = vld [vmem:[%s550_s1 + $0x28] sm:$0xff]  }
   0x5   :  { %v438_v10 = vld [vmem:[%s550_s1 + $0x80] sm:$0xff]   ;;  %v435_v13 = vld [vmem:[%s550_s1 + $0x70] sm:$0xff]   ;;  %v443_v15 = vld [vmem:[%s550_s1 + $0x88] sm:$0xff]  }
   0x6   :  { %415 = vmatprep.subr.bf16.mxu1 %v438_v10  ;;  %v442_v14 = vld [vmem:[%s551_s0 + $0x4] ss:$12 sps:$4 sm:$0xff]   ;;  %v444_v16 = vld [vmem:[%s551_s0 + $0x8] ss:$12 sps:$4 sm:$0xff]   ;;  %v445_v17 = vld [vmem:[%s551_s0 + $0x20] ss:$12 sps:$4 sm:$0xff]  }
   0x7   :  { %386 = vmatpush3.bf16.msra.mxu0 %v426_v3  ;;  %416 = vmatpush3.bf16.msra.mxu1 %v438_v10  ;;  %v436_v18 = vld [vmem:[%s550_s1 + $0x30] sm:$0xff]   ;;  %v437_v19 = vld [vmem:[%s550_s1 + $0x78] sm:$0xff]   ;;  %v440_v21 = vld [vmem:[%s551_s0] ss:$12 sps:$4 sm:$0xff]  }
   0x8   :  { %387 = vmatprep.subr.bf16.mxu0 %v427_v4  ;;  %243 = vmatprep.mubr.bf16.mxu0 %v442_v14  ;;  %v439_v20 = vld [vmem:[%s550_s1 + $0x38] sm:$0xff]   ;;  %v337_v30 = vld [vmem:[%s552_s2] ss:$0 sm:$0xff] }
   0x9   :  { %417 = vmatprep.subr.bf16.mxu1 %v443_v15  ;;  %419 = vmatprep.mubr.msk.bf16.mxu1 %vm204_vm0, %v444_v16  ;;  %v446_v22 = vld [vmem:[%s551_s0 + $0x1c] ss:$12 sps:$4 sm:$0xff]   ;;  %v448_v23 = vld [vmem:[%s551_s0 + $0x18] ss:$12 sps:$4 sm:$0xff]  }
   0xb   :  { %388 = vmatpush3.bf16.msra.mxu0 %v428_v5  ;;  %418 = vmatpush3.bf16.msra.mxu1 %v443_v15 }
   0xc   :  { %389 = vmatprep.subr.bf16.mxu0 %v429_v6 }
   0xe   :  { %420 = vmatmul.mubr.msk.bf16.vlgmr.msra.gmra.mrb[0].mxu1 %vm204_vm0, %v445_v17 }
   0xf   :  { %390 = vmatpush3.bf16.msra.mxu0 %v430_v7 }
  0x10   :  { %391 = vmatprep.subr.bf16.mxu0 %v431_v8 }
  0x13   :  { %392 = vmatpush3.bf16.msra.mxu0 %v432_v9 }
  0x14   :  { %393 = vmatprep.subr.bf16.mxu0 %v433_v11 }
  0x17   :  { %394 = vmatpush3.bf16.msra.mxu0 %v434_v12 }
  0x18   :  { %395 = vmatprep.subr.bf16.mxu0 %v435_v13 }
  0x1b   :  { %396 = vmatpush3.bf16.msra.mxu0 %v436_v18 }
  0x1c   :  { %397 = vmatprep.subr.bf16.mxu0 %v437_v19 }
  0x1f   :  { %398 = vmatpush3.bf16.msra.mxu0 %v439_v20 }
  0x22   :  { %244 = vmatmul.mubr.bf16.vlgmr.msra.gmra.mrb[0].mxu0 %v440_v21 }
  0x23   :  { %251 = vmatprep.mubr.bf16.mxu0 %v446_v22 }
  0x2a   :  { %252 = vmatmul.mubr.bf16.gmra.mrb[4].mxu0 %v448_v23 }
  0xe1   :  { %v421_v24 = vpop.f32.mrb[0].mxu1 }
  0xe2   :  { %v294_v25 = vpop.f32.mrb[1].mxu1 }
  0xe3   :  { %v422_v26 = vpop.f32.mrb[2].mxu1 }
  0xe4   :  { %v297_v27 = vpop.f32.mrb[3].mxu1 }
  0xf5   :  { %v399_v28 = vpop.f32.mrb[0].mxu0 }
  0xf6   :  { %v400_v29 = vpop.f32.mrb[1].mxu0 }
  0xf7   :  { %v401_v31 = vadd.f32 %v400_v29, %v399_v28  ;;  %v402_v32 = vpop.f32.mrb[2].mxu0 }
  0xf8   :  { %v403_v33 = vpop.f32.mrb[3].mxu0 }
  0xf9   :  { %v404_v34 = vadd.f32 %v403_v33, %v402_v32  ;;  %v246_v35 = vadd.f32 %v401_v31, %v337_v30 }
  0xfb   :  { %v295_v36 = vadd.f32 %v294_v25, %v246_v35  ;;  %v249_v37 = vadd.f32 %v404_v34, %v337_v30 }
  0xfd   :  { %v298_v38 = vadd.f32 %v297_v27, %v249_v37  ;;  %v405_v39 = vpop.f32.mrb[4].mxu0  ;;  %v309_v41 = vmax.f32 %v295_v36, 0.0 }
  0xfe   :  { %v406_v40 = vpop.f32.mrb[5].mxu0 }
  0xff   :  { %v310_v42 = vmax.f32 %v298_v38, 0.0  ;;  %v407_v43 = vadd.f32 %v406_v40, %v405_v39  ;;  %v408_v44 = vpop.f32.mrb[6].mxu0 }
 0x100   :  { %v409_v45 = vpop.f32.mrb[7].mxu0 }
 0x101   :  { %v375_v46 = vpack.c.bf16 %v310_v42, %v309_v41  ;;  %v254_v47 = vadd.f32 %v407_v43, %v337_v30  ;;  %v410_v48 = vadd.f32 %v409_v45, %v408_v44 }
 0x103   :  { %376 = vst [vmem:[%s553_s3] sm:$0xff] %v375_v46   ;;  %v303_v49 = vadd.f32 %v421_v24, %v254_v47  ;;  %v257_v50 = vadd.f32 %v410_v48, %v337_v30 }
 0x105   :  { %v306_v51 = vadd.f32 %v422_v26, %v257_v50  ;;  %v311_v52 = vmax.f32 %v303_v49, 0.0 }
 0x107   :  { %v312_v53 = vmax.f32 %v306_v51, 0.0 }
 0x109   :  { %v380_v54 = vpack.c.bf16 %v312_v53, %v311_v52 }
 0x10b   :  { %382 = vst [vmem:[%s553_s3 + $0x8] sm:$0xff] %v380_v54  }

// kernel: vqvae_forward.11
= control target key start
LH: loop header
LB: loop body
LE: loop exit
PB: predicated region body
PF: predicated region fallthrough
CT: control target
= control target key end

     0   :  { %vm221_vm0 = vcmask 261120   ;;  %s2252_s1 = inlined_call_operand.vmem [shape: bf16[288,128], index: 1, kind: input, shape index: {}]   ;;  %s2253_s0 = inlined_call_operand.vmem [shape: bf16[32,288], index: 0, kind: input, shape index: {}]   ;;  %s2254_s3 = inlined_call_operand.vmem [shape: bf16[128,128], index: 3, kind: input, shape index: {}]   ;;  %s2255_s6 = inlined_call_operand.vmem [shape: f32[512,128], index: 6, kind: input, shape index: {}]   ;;  %s2256_s2 = inlined_call_operand.vmem [shape: f32[1,128], index: 2, kind: input, shape index: {}]   ;;  %s2257_s5 = inlined_call_operand.vmem [shape: f32[32,128], index: 5, kind: input, shape index: {}]   ;;  %s2258_s4 = inlined_call_operand.vmem [shape: f32[1,128], index: 4, kind: input, shape index: {}]   ;;  %s2259_s8 = inlined_call_operand.vmem [shape: f32[32,128], index: 8, kind: output, shape index: {0}]   ;;  %s2260_s7 = inlined_call_operand.vmem [shape: f32[1,512], index: 7, kind: input, shape index: {}]   ;;  %s2261_s9 = inlined_call_operand.vmem [shape: f32[32,128], index: 9, kind: output, shape index: {1}]  }
   0x1   :  { %v1594_v0 = vld [vmem:[%s2252_s1 + $0x40] sm:$0xff]   ;;  %v1596_v2 = vld [vmem:[%s2252_s1 + $0x48] sm:$0xff]   ;;  %v1598_v4 = vld [vmem:[%s2252_s1 + $0x50] sm:$0xff]  }
   0x2   :  { %v1595_v1 = vld [vmem:[%s2252_s1] sm:$0xff]   ;;  %1227 = vmatprep.subr.bf16.mxu0 %v1594_v0  ;;  %v1597_v3 = vld [vmem:[%s2252_s1 + $0x8] sm:$0xff]   ;;  %v1599_v5 = vld [vmem:[%s2252_s1 + $0x10] sm:$0xff]  }
   0x3   :  { %1228 = vmatpush3.bf16.msra.mxu0 %v1595_v1  ;;  %v1600_v6 = vld [vmem:[%s2252_s1 + $0x58] sm:$0xff]   ;;  %v1602_v8 = vld [vmem:[%s2252_s1 + $0x60] sm:$0xff]   ;;  %v1604_v11 = vld [vmem:[%s2252_s1 + $0x68] sm:$0xff]  }
   0x4   :  { %1229 = vmatprep.subr.bf16.mxu0 %v1596_v2  ;;  %v1601_v7 = vld [vmem:[%s2252_s1 + $0x18] sm:$0xff]   ;;  %v1603_v9 = vld [vmem:[%s2252_s1 + $0x20] sm:$0xff]   ;;  %v1605_v12 = vld [vmem:[%s2252_s1 + $0x28] sm:$0xff]  }
   0x5   :  { %v1609_v10 = vld [vmem:[%s2252_s1 + $0x80] sm:$0xff]   ;;  %v1606_v13 = vld [vmem:[%s2252_s1 + $0x70] sm:$0xff]   ;;  %v1614_v15 = vld [vmem:[%s2252_s1 + $0x88] sm:$0xff]  }
   0x6   :  { %1437 = vmatprep.subr.bf16.mxu1 %v1609_v10  ;;  %v1613_v14 = vld [vmem:[%s2253_s0 + $0x4] ss:$12 sps:$4 sm:$0xff]   ;;  %v1615_v16 = vld [vmem:[%s2253_s0 + $0x8] ss:$12 sps:$4 sm:$0xff]   ;;  %v1616_v17 = vld [vmem:[%s2253_s0 + $0x20] ss:$12 sps:$4 sm:$0xff]  }
   0x7   :  { %1230 = vmatpush3.bf16.msra.mxu0 %v1597_v3  ;;  %1438 = vmatpush3.bf16.msra.mxu1 %v1609_v10  ;;  %v1607_v18 = vld [vmem:[%s2252_s1 + $0x30] sm:$0xff]   ;;  %v1608_v19 = vld [vmem:[%s2252_s1 + $0x78] sm:$0xff]   ;;  %v1620_v20 = vld [vmem:[%s2254_s3] sm:$0xff]  }
   0x8   :  { %1231 = vmatprep.subr.bf16.mxu0 %v1598_v4  ;;  %260 = vmatprep.mubr.bf16.mxu0 %v1613_v14  ;;  %v1621_v21 = vld [vmem:[%s2254_s3 + $0x8] sm:$0xff]   ;;  %v1610_v22 = vld [vmem:[%s2252_s1 + $0x38] sm:$0xff]   ;;  %v1622_v23 = vld [vmem:[%s2254_s3 + $0x10] sm:$0xff]  }
   0x9   :  { %1439 = vmatprep.subr.bf16.mxu1 %v1614_v15  ;;  %1441 = vmatprep.mubr.msk.bf16.mxu1 %vm221_vm0, %v1615_v16  ;;  %v1611_v24 = vld [vmem:[%s2253_s0] ss:$12 sps:$4 sm:$0xff]   ;;  %v1617_v25 = vld [vmem:[%s2253_s0 + $0x1c] ss:$12 sps:$4 sm:$0xff]   ;;  %v1619_v26 = vld [vmem:[%s2253_s0 + $0x18] ss:$12 sps:$4 sm:$0xff]  }
   0xa   :  { %v1623_v27 = vld [vmem:[%s2254_s3 + $0x18] sm:$0xff]   ;;  %v1624_v28 = vld [vmem:[%s2254_s3 + $0x20] sm:$0xff]   ;;  %v1625_v29 = vld [vmem:[%s2254_s3 + $0x28] sm:$0xff]  }
   0xb   :  { %1232 = vmatpush3.bf16.msra.mxu0 %v1599_v5  ;;  %1440 = vmatpush3.bf16.msra.mxu1 %v1614_v15  ;;  %v1626_v30 = vld [vmem:[%s2254_s3 + $0x30] sm:$0xff]   ;;  %v1627_v31 = vld [vmem:[%s2254_s3 + $0x38] sm:$0xff]   ;;  %v484_v32 = vld [vmem:[%s2255_s6 + $0x80] sm:$0xff] }
   0xc   :  { %1233 = vmatprep.subr.bf16.mxu0 %v1600_v6  ;;  %1445 = vmatprep.subr.bf16.mxu1 %v1620_v20  ;;  %v485_v33 = vld [vmem:[%s2255_s6 + $0x88] sm:$0xff]  ;;  %v516_v34 = vld [vmem:[%s2255_s6 + $0x180] sm:$0xff]  ;;  %v486_v41 = vld [vmem:[%s2255_s6 + $0x90] sm:$0xff] }
   0xd   :  { %v1786_v35 = vpack.c.bf16 %v485_v33, %v484_v32  ;;  %v517_v36 = vld [vmem:[%s2255_s6 + $0x188] sm:$0xff]  ;;  %v468_v37 = vld [vmem:[%s2255_s6] sm:$0xff]  ;;  %v487_v42 = vld [vmem:[%s2255_s6 + $0x98] sm:$0xff] }
   0xe   :  { %1442 = vmatmul.mubr.msk.bf16.vlgmr.msra.gmra.mrb[0].mxu1 %vm221_vm0, %v1616_v17  ;;  %v469_v38 = vld [vmem:[%s2255_s6 + $0x8] sm:$0xff]  ;;  %v1797_v39 = vpack.c.bf16 %v517_v36, %v516_v34  ;;  %v1810_v43 = vpack.c.bf16 %v487_v42, %v486_v41  ;;  %v470_v44 = vld [vmem:[%s2255_s6 + $0x10] sm:$0xff]  ;;  %v471_v45 = vld [vmem:[%s2255_s6 + $0x18] sm:$0xff] }
   0xf   :  { %1234 = vmatpush3.bf16.msra.mxu0 %v1601_v7  ;;  %1446 = vmatpush3.bf16.msra.mxu1 %v1620_v20  ;;  %v1799_v40 = vpack.c.bf16 %v469_v38, %v468_v37  ;;  %v1819_v46 = vpack.c.bf16 %v471_v45, %v470_v44  ;;  %v488_v47 = vld [vmem:[%s2255_s6 + $0xa0] sm:$0xff]  ;;  %v489_v48 = vld [vmem:[%s2255_s6 + $0xa8] sm:$0xff]  ;;  %v490_v53 = vld [vmem:[%s2255_s6 + $0xb0] sm:$0xff] }
  0x10   :  { %1235 = vmatprep.subr.bf16.mxu0 %v1602_v8  ;;  %1447 = vmatprep.subr.bf16.mxu1 %v1621_v21  ;;  %v1827_v49 = vpack.c.bf16 %v489_v48, %v488_v47  ;;  %v472_v50 = vld [vmem:[%s2255_s6 + $0x20] sm:$0xff]  ;;  %v473_v51 = vld [vmem:[%s2255_s6 + $0x28] sm:$0xff]  ;;  %v491_v54 = vld [vmem:[%s2255_s6 + $0xb8] sm:$0xff] }
  0x11   :  { %v1837_v52 = vpack.c.bf16 %v473_v51, %v472_v50  ;;  %v1845_v55 = vpack.c.bf16 %v491_v54, %v490_v53  ;;  %v474_v56 = vld [vmem:[%s2255_s6 + $0x30] sm:$0xff]  ;;  %v475_v57 = vld [vmem:[%s2255_s6 + $0x38] sm:$0xff]  ;;  %v492_v59 = vld [vmem:[%s2255_s6 + $0xc0] sm:$0xff] }
  0x12   :  { %v1855_v58 = vpack.c.bf16 %v475_v57, %v474_v56  ;;  %v493_v60 = vld [vmem:[%s2255_s6 + $0xc8] sm:$0xff]  ;;  %v476_v62 = vld [vmem:[%s2255_s6 + $0x40] sm:$0xff]  ;;  %v494_v1 = vld [vmem:[%s2255_s6 + $0xd0] sm:$0xff] }
  0x13   :  { %1236 = vmatpush3.bf16.msra.mxu0 %v1603_v9  ;;  %1448 = vmatpush3.bf16.msra.mxu1 %v1621_v21  ;;  %v1863_v61 = vpack.c.bf16 %v493_v60, %v492_v59  ;;  %v477_v63 = vld [vmem:[%s2255_s6 + $0x48] sm:$0xff]  ;;  %v495_v2 = vld [vmem:[%s2255_s6 + $0xd8] sm:$0xff]  ;;  %v478_v4 = vld [vmem:[%s2255_s6 + $0x50] sm:$0xff] }
  0x14   :  { %1237 = vmatprep.subr.bf16.mxu0 %v1604_v11  ;;  %1449 = vmatprep.subr.bf16.mxu1 %v1622_v23  ;;  %v1873_v0 = vpack.c.bf16 %v477_v63, %v476_v62  ;;  %v1881_v3 = vpack.c.bf16 %v495_v2, %v494_v1  ;;  %v479_v5 = vld [vmem:[%s2255_s6 + $0x58] sm:$0xff]  ;;  %v496_v7 = vld [vmem:[%s2255_s6 + $0xe0] sm:$0xff]  ;;  %v497_v8 = vld [vmem:[%s2255_s6 + $0xe8] sm:$0xff] }
  0x15   :  { %v1891_v6 = vpack.c.bf16 %v479_v5, %v478_v4  ;;  %v1899_v9 = vpack.c.bf16 %v497_v8, %v496_v7  ;;  %v480_v10 = vld [vmem:[%s2255_s6 + $0x60] sm:$0xff]  ;;  %v481_v11 = vld [vmem:[%s2255_s6 + $0x68] sm:$0xff]  ;;  %v499_v14 = vld [vmem:[%s2255_s6 + $0xf8] sm:$0xff] }
  0x16   :  { %v500_v50 = vld [vmem:[%s2255_s6 + $0x100] sm:$0xff]  ;;  %v501_v51 = vld [vmem:[%s2255_s6 + $0x108] sm:$0xff]  ;;  %v518_v53 = vld [vmem:[%s2255_s6 + $0x190] sm:$0xff] }
  0x17   :  { %1238 = vmatpush3.bf16.msra.mxu0 %v1605_v12  ;;  %1450 = vmatpush3.bf16.msra.mxu1 %v1622_v23  ;;  %v1909_v12 = vpack.c.bf16 %v481_v11, %v480_v10  ;;  %v519_v54 = vld [vmem:[%s2255_s6 + $0x198] sm:$0xff]  ;;  %v1936_v59 = vpack.c.bf16 %v501_v51, %v500_v50  ;;  %v502_v63 = vld [vmem:[%s2255_s6 + $0x110] sm:$0xff]  ;;  %v520_v2 = vld [vmem:[%s2255_s6 + $0x1a0] sm:$0xff] }
  0x18   :  { %1239 = vmatprep.subr.bf16.mxu0 %v1606_v13  ;;  %1451 = vmatprep.subr.bf16.mxu1 %v1623_v27  ;;  %v498_v13 = vld [vmem:[%s2255_s6 + $0xf0] sm:$0xff]  ;;  %v1938_v62 = vpack.c.bf16 %v519_v54, %v518_v53  ;;  %v503_v1 = vld [vmem:[%s2255_s6 + $0x118] sm:$0xff]  ;;  %v521_v4 = vld [vmem:[%s2255_s6 + $0x1a8] sm:$0xff] }
  0x19   :  { %v1917_v15 = vpack.c.bf16 %v499_v14, %v498_v13  ;;  %v1954_v5 = vpack.c.bf16 %v503_v1, %v502_v63  ;;  %v1956_v7 = vpack.c.bf16 %v521_v4, %v520_v2  ;;  %v504_v8 = vld [vmem:[%s2255_s6 + $0x120] sm:$0xff]  ;;  %v505_v10 = vld [vmem:[%s2255_s6 + $0x128] sm:$0xff]  ;;  %v522_v11 = vld [vmem:[%s2255_s6 + $0x1b0] sm:$0xff] }
  0x1a   :  { %v523_v13 = vld [vmem:[%s2255_s6 + $0x1b8] sm:$0xff]  ;;  %v1972_v14 = vpack.c.bf16 %v505_v10, %v504_v8  ;;  %v447_v54 = vld [vmem:[%s2257_s5 + $0x10] sm:$0xff] }
  0x1b   :  { %1240 = vmatpush3.bf16.msra.mxu0 %v1607_v18  ;;  %1452 = vmatpush3.bf16.msra.mxu1 %v1623_v27  ;;  %v515_v51 = vld [vmem:[%s2255_s6 + $0x178] sm:$0xff] }
  0x1c   :  { %1241 = vmatprep.subr.bf16.mxu0 %v1608_v19  ;;  %1453 = vmatprep.subr.bf16.mxu1 %v1624_v28  ;;  %v448_v63 = vld [vmem:[%s2257_s5 + $0x18] sm:$0xff] }
  0x1f   :  { %1242 = vmatpush3.bf16.msra.mxu0 %v1610_v22  ;;  %1454 = vmatpush3.bf16.msra.mxu1 %v1624_v28  ;;  %v1159_v22 = vld [vmem:[%s2256_s2] ss:$0 sm:$0xff] }
  0x20   :  { %1455 = vmatprep.subr.bf16.mxu1 %v1625_v29  ;;  %1466 = vmatprep.subr.bf16.mxu0 %v1786_v35 }
  0x22   :  { %261 = vmatmul.mubr.bf16.vlgmr.msra.gmra.mrb[0].mxu0 %v1611_v24 }
  0x23   :  { %268 = vmatprep.mubr.bf16.mxu0 %v1617_v25  ;;  %1456 = vmatpush3.bf16.msra.mxu1 %v1625_v29 }
  0x24   :  { %1457 = vmatprep.subr.bf16.mxu1 %v1626_v30 }
  0x27   :  { %1458 = vmatpush3.bf16.msra.mxu1 %v1626_v30 }
  0x28   :  { %1459 = vmatprep.subr.bf16.mxu1 %v1627_v31  ;;  %1468 = vmatpush3.bf16.xpose.msra.mxu0 %v1799_v40 }
  0x29   :  { %1470 = vmatprep.subr.bf16.mxu0 %v1810_v43 }
  0x2a   :  { %269 = vmatmul.mubr.bf16.gmra.mrb[4].mxu0 %v1619_v26 }
  0x2b   :  { %1460 = vmatpush3.bf16.msra.mxu1 %v1627_v31 }
  0x2c   :  { %1498 = vmatprep.subr.bf16.mxu1 %v1797_v39 }
  0x30   :  { %1472 = vmatpush3.bf16.xpose.msra.mxu0 %v1819_v46 }
  0x31   :  { %1474 = vmatprep.subr.bf16.mxu0 %v1827_v49 }
  0x38   :  { %1476 = vmatpush3.bf16.xpose.msra.mxu0 %v1837_v52 }
  0x39   :  { %1478 = vmatprep.subr.bf16.mxu0 %v1845_v55 }
  0x40   :  { %1480 = vmatpush3.bf16.xpose.msra.mxu0 %v1855_v58 }
  0x41   :  { %1482 = vmatprep.subr.bf16.mxu0 %v1863_v61 }
  0x48   :  { %1484 = vmatpush3.bf16.xpose.msra.mxu0 %v1873_v0 }
  0x49   :  { %1486 = vmatprep.subr.bf16.mxu0 %v1881_v3 }
  0x50   :  { %1488 = vmatpush3.bf16.xpose.msra.mxu0 %v1891_v6 }
  0x51   :  { %1490 = vmatprep.subr.bf16.mxu0 %v1899_v9 }
  0x58   :  { %1492 = vmatpush3.bf16.xpose.msra.mxu0 %v1909_v12 }
  0x59   :  { %1494 = vmatprep.subr.bf16.mxu0 %v1917_v15 }
  0xe1   :  { %v1443_v16 = vpop.f32.mrb[0].mxu1 }
  0xe2   :  { %v311_v17 = vpop.f32.mrb[1].mxu1 }
  0xe3   :  { %v1444_v18 = vpop.f32.mrb[2].mxu1 }
  0xe4   :  { %v314_v19 = vpop.f32.mrb[3].mxu1 }
  0xf5   :  { %v1243_v20 = vpop.f32.mrb[0].mxu0 }
  0xf6   :  { %v1244_v21 = vpop.f32.mrb[1].mxu0 }
  0xf7   :  { %v1245_v23 = vadd.f32 %v1244_v21, %v1243_v20  ;;  %v1246_v24 = vpop.f32.mrb[2].mxu0  ;;  %v525_v20 = vld [vmem:[%s2255_s6 + $0x1c8] sm:$0xff] }
  0xf8   :  { %v1247_v25 = vpop.f32.mrb[3].mxu0 }
  0xf9   :  { %v1248_v26 = vadd.f32 %v1247_v25, %v1246_v24  ;;  %v263_v27 = vadd.f32 %v1245_v23, %v1159_v22  ;;  %v508_v23 = vld [vmem:[%s2255_s6 + $0x140] sm:$0xff]  ;;  %v509_v24 = vld [vmem:[%s2255_s6 + $0x148] sm:$0xff]  ;;  %v526_v25 = vld [vmem:[%s2255_s6 + $0x1d0] sm:$0xff] }
  0xfb   :  { %v312_v28 = vadd.f32 %v311_v17, %v263_v27  ;;  %v266_v29 = vadd.f32 %v1248_v26, %v1159_v22  ;;  %v506_v17 = vld [vmem:[%s2255_s6 + $0x130] sm:$0xff]  ;;  %v527_v26 = vld [vmem:[%s2255_s6 + $0x1d8] sm:$0xff]  ;;  %v2008_v27 = vpack.c.bf16 %v509_v24, %v508_v23 }
  0xfd   :  { %v315_v30 = vadd.f32 %v314_v19, %v266_v29  ;;  %v1249_v31 = vpop.f32.mrb[4].mxu0  ;;  %v326_v33 = vmax.f32 %v312_v28, 0.0  ;;  %v524_v19 = vld [vmem:[%s2255_s6 + $0x1c0] sm:$0xff]  ;;  %v2010_v28 = vpack.c.bf16 %v527_v26, %v526_v25  ;;  %v510_v29 = vld [vmem:[%s2255_s6 + $0x150] sm:$0xff] }
  0xfe   :  { %v1250_v32 = vpop.f32.mrb[5].mxu0 }
  0xff   :  { %v327_v34 = vmax.f32 %v315_v30, 0.0  ;;  %v1251_v36 = vadd.f32 %v1250_v32, %v1249_v31  ;;  %v1252_v37 = vpop.f32.mrb[6].mxu0  ;;  %v511_v30 = vld [vmem:[%s2255_s6 + $0x158] sm:$0xff]  ;;  %v528_v31 = vld [vmem:[%s2255_s6 + $0x1e0] sm:$0xff]  ;;  %v529_v32 = vld [vmem:[%s2255_s6 + $0x1e8] sm:$0xff] }
 0x100   :  { %v1253_v38 = vpop.f32.mrb[7].mxu0 }
 0x101   :  { %v330_v41 = vpack.c.bf16 %v327_v34, %v326_v33  ;;  %v271_v42 = vadd.f32 %v1251_v36, %v1159_v22  ;;  %v1254_v44 = vadd.f32 %v1253_v38, %v1252_v37  ;;  %v2026_v33 = vpack.c.bf16 %v511_v30, %v510_v29  ;;  %v512_v36 = vld [vmem:[%s2255_s6 + $0x160] sm:$0xff]  ;;  %v513_v37 = vld [vmem:[%s2255_s6 + $0x168] sm:$0xff]  ;;  %v530_v38 = vld [vmem:[%s2255_s6 + $0x1f0] sm:$0xff] }
 0x102   :  { %v2028_v34 = vpack.c.bf16 %v529_v32, %v528_v31 }
 0x103   :  { %v320_v45 = vadd.f32 %v1443_v16, %v271_v42  ;;  %v274_v47 = vadd.f32 %v1254_v44, %v1159_v22  ;;  %1461 = vmatprep.mubr.bf16.mxu1 %v330_v41  ;;  %v1974_v16 = vpack.c.bf16 %v523_v13, %v522_v11  ;;  %v1992_v22 = vpack.c.bf16 %v525_v20, %v524_v19  ;;  %v531_v41 = vld [vmem:[%s2255_s6 + $0x1f8] sm:$0xff] }
 0x104   :  { %v2044_v42 = vpack.c.bf16 %v513_v37, %v512_v36  ;;  %v2046_v44 = vpack.c.bf16 %v531_v41, %v530_v38 }
 0x105   :  { %v323_v48 = vadd.f32 %v1444_v18, %v274_v47  ;;  %v328_v56 = vmax.f32 %v320_v45, 0.0  ;;  %v507_v18 = vld [vmem:[%s2255_s6 + $0x138] sm:$0xff]  ;;  %v482_v45 = vld [vmem:[%s2255_s6 + $0x70] sm:$0xff] }
 0x106   :  { %v1990_v21 = vpack.c.bf16 %v507_v18, %v506_v17  ;;  %v483_v47 = vld [vmem:[%s2255_s6 + $0x78] sm:$0xff] }
 0x107   :  { %v329_v57 = vmax.f32 %v323_v48, 0.0  ;;  %v514_v48 = vld [vmem:[%s2255_s6 + $0x170] sm:$0xff]  ;;  %v2059_v50 = vpack.c.bf16 %v483_v47, %v482_v45 }
 0x108   :  { %v2064_v53 = vpack.c.bf16 %v515_v51, %v514_v48 }
 0x109   :  { %v331_v60 = vpack.c.bf16 %v329_v57, %v328_v56  ;;  %1496 = vmatpush3.bf16.xpose.msra.mxu0 %v2059_v50  ;;  %v445_v56 = vld [vmem:[%s2257_s5] sm:$0xff] }
 0x10a   :  { %1530 = vmatprep.subr.bf16.mxu0 %v1786_v35 }
 0x10b   :  { %1462 = vmatmul.mubr.bf16.vlgmr.msra.gmra.mrb[4].mxu1 %v331_v60  ;;  %v1194_v60 = vld [vmem:[%s2258_s4] ss:$0 sm:$0xff] }
 0x10c   :  { %1500 = vmatpush3.bf16.xpose.msra.mxu1 %v1936_v59 }
 0x10d   :  { %1502 = vmatprep.subr.bf16.mxu1 %v1938_v62 }
 0x114   :  { %1504 = vmatpush3.bf16.xpose.msra.mxu1 %v1954_v5 }
 0x115   :  { %1506 = vmatprep.subr.bf16.mxu1 %v1956_v7 }
 0x11c   :  { %1508 = vmatpush3.bf16.xpose.msra.mxu1 %v1972_v14 }
 0x11d   :  { %1510 = vmatprep.subr.bf16.mxu1 %v1974_v16 }
 0x124   :  { %1512 = vmatpush3.bf16.xpose.msra.mxu1 %v1990_v21 }
 0x125   :  { %1514 = vmatprep.subr.bf16.mxu1 %v1992_v22 }
 0x12c   :  { %1516 = vmatpush3.bf16.xpose.msra.mxu1 %v2008_v27 }
 0x12d   :  { %1518 = vmatprep.subr.bf16.mxu1 %v2010_v28 }
 0x134   :  { %1520 = vmatpush3.bf16.xpose.msra.mxu1 %v2026_v33 }
 0x135   :  { %1522 = vmatprep.subr.bf16.mxu1 %v2028_v34 }
 0x13c   :  { %1524 = vmatpush3.bf16.xpose.msra.mxu1 %v2044_v42 }
 0x13d   :  { %1526 = vmatprep.subr.bf16.mxu1 %v2046_v44 }
 0x144   :  { %1528 = vmatpush3.bf16.xpose.msra.mxu1 %v2064_v53 }
 0x145   :  { %1562 = vmatprep.subr.bf16.mxu1 %v1797_v39  ;;  %v446_v39 = vld [vmem:[%s2257_s5 + $0x8] sm:$0xff] }
 0x1de   :  { %v1463_v57 = vpop.f32.mrb[4].mxu1 }
 0x1df   :  { %v451_v35 = vadd.f32 %v1463_v57, %v447_v54  ;;  %v430_v1 = vpop.f32.mrb[5].mxu1 }
 0x1e0   :  { %v449_v2 = vadd.f32 %v445_v56, %v430_v1  ;;  %v1464_v4 = vpop.f32.mrb[6].mxu1 }
 0x1e1   :  { %v462_v8 = vadd.f32 %v1194_v60, %v451_v35  ;;  %v452_v10 = vadd.f32 %v1464_v4, %v448_v63  ;;  %v433_v11 = vpop.f32.mrb[7].mxu1 }
 0x1e2   :  { %v460_v13 = vadd.f32 %v1194_v60, %v449_v2  ;;  %v450_v17 = vadd.f32 %v446_v39, %v433_v11 }
 0x1e3   :  { %466 = vst [vmem:[%s2259_s8 + $0x10] sm:$0xff] %v462_v8  ;;  %v463_v18 = vadd.f32 %v1194_v60, %v452_v10  ;;  %v534_v19 = vmul.f32 %v462_v8, %v462_v8 }
 0x1e4   :  { %464 = vst [vmem:[%s2259_s8] sm:$0xff] %v460_v13  ;;  %v461_v20 = vadd.f32 %v1194_v60, %v450_v17  ;;  %1301 = vmatprep.mubr.f32.mxu0 %v460_v13  ;;  %1341 = vmatprep.mubr.f32.mxu1 %v460_v13  ;;  %v532_v23 = vmul.f32 %v460_v13, %v460_v13 }
 0x1e5   :  { %467 = vst [vmem:[%s2259_s8 + $0x18] sm:$0xff] %v463_v18  ;;  %540 = vadd.xlane.f32.xlu1 %v534_v19  ;;  %1302 = vmatmul.mubr.f32.vlgmr.msra.gmra.mrb[8].mxu0 %v460_v13  ;;  %v535_v24 = vmul.f32 %v463_v18, %v463_v18 }
 0x1e6   :  { %465 = vst [vmem:[%s2259_s8 + $0x8] sm:$0xff] %v461_v20  ;;  %1342 = vmatmul.mubr.f32.vlgmr.msra.gmra.mrb[8].mxu1 %v460_v13  ;;  %536 = vadd.xlane.f32.xlu0 %v532_v23  ;;  %v533_v25 = vmul.f32 %v461_v20, %v461_v20 }
 0x1e7   :  { %1303 = vmatprep.mubr.f32.mxu0 %v461_v20  ;;  %1343 = vmatprep.mubr.f32.mxu1 %v461_v20 }
 0x1e8   :  { %1532 = vmatpush3.bf16.msra.mxu0 %v1799_v40  ;;  %1564 = vmatpush3.bf16.msra.mxu1 %v1936_v59  ;;  %v756_v40 = vlaneseq }
 0x1e9   :  { %542 = vadd.xlane.f32.xlu1 %v535_v24  ;;  %1304 = vmatmul.mubr.f32.gmra.mrb[10].mxu0 %v461_v20 }
 0x1ea   :  { %1344 = vmatmul.mubr.f32.gmra.mrb[10].mxu1 %v461_v20  ;;  %1305 = vmatprep.mubr.f32.mxu0 %v462_v8 }
 0x1eb   :  { %1345 = vmatprep.mubr.f32.mxu1 %v462_v8  ;;  %538 = vadd.xlane.f32.xlu0 %v533_v25 }
 0x1ec   :  { %1534 = vmatprep.subr.bf16.mxu0 %v1810_v43  ;;  %1566 = vmatprep.subr.bf16.mxu1 %v1938_v62  ;;  %v757_v43 = vshrl.u32 %v756_v40, 7 }
 0x1ed   :  { %1306 = vmatmul.mubr.f32.gmra.mrb[12].mxu0 %v462_v8  ;;  %1568 = vmatpush3.bf16.msra.mxu1 %v1954_v5 }
 0x1ee   :  { %1346 = vmatmul.mubr.f32.gmra.mrb[12].mxu1 %v462_v8  ;;  %1307 = vmatprep.mubr.f32.mxu0 %v463_v18 }
 0x1ef   :  { %1347 = vmatprep.mubr.f32.mxu1 %v463_v18  ;;  %1536 = vmatpush3.bf16.msra.mxu0 %v1819_v46  ;;  %v758_v46 = vsub.s32 0, %v757_v43 }
 0x1f0   :  { %1538 = vmatprep.subr.bf16.mxu0 %v1827_v49  ;;  %1570 = vmatprep.subr.bf16.mxu1 %v1956_v7  ;;  %v754_v49 = vld [vmem:[%s2260_s7] sm:$0xf] }
 0x1f1   :  { %1308 = vmatmul.mubr.f32.gmra.mrb[14].mxu0 %v463_v18  ;;  %1572 = vmatpush3.bf16.msra.mxu1 %v1972_v14 }
 0x1f2   :  { %1348 = vmatmul.mubr.f32.gmra.mrb[14].mxu1 %v463_v18  ;;  %1574 = vmatprep.subr.bf16.mxu1 %v1974_v16 }
 0x1f3   :  { %1540 = vmatpush3.bf16.msra.mxu0 %v1837_v52  ;;  %v762_v52 = vsub.s32 1, %v757_v43 }
 0x1f4   :  { %1542 = vmatprep.subr.bf16.mxu0 %v1845_v55 }
 0x1f5   :  { %1576 = vmatpush3.bf16.msra.mxu1 %v1990_v21  ;;  %v2133_v62 = vrot.slane %v754_v49, %v762_v52 }
 0x1f6   :  { %1578 = vmatprep.subr.bf16.mxu1 %v1992_v22 }
 0x1f7   :  { %1544 = vmatpush3.bf16.msra.mxu0 %v1855_v58 }
 0x1f8   :  { %1546 = vmatprep.subr.bf16.mxu0 %v1863_v61  ;;  %v766_v61 = vsub.s32 2, %v757_v43 }
 0x1f9   :  { %1580 = vmatpush3.bf16.msra.mxu1 %v2008_v27 }
 0x1fa   :  { %1582 = vmatprep.subr.bf16.mxu1 %v2010_v28  ;;  %v2135_v16 = vrot.slane %v754_v49, %v766_v61 }
 0x1fb   :  { %1548 = vmatpush3.bf16.msra.mxu0 %v1873_v0 }
 0x1fc   :  { %1550 = vmatprep.subr.bf16.mxu0 %v1881_v3  ;;  %v2131_v3 = vrot.slane %v754_v49, %v758_v46 }
 0x1fd   :  { %1584 = vmatpush3.bf16.msra.mxu1 %v2026_v33 }
 0x1fe   :  { %1586 = vmatprep.subr.bf16.mxu1 %v2028_v34 }
 0x1ff   :  { %1552 = vmatpush3.bf16.msra.mxu0 %v1891_v6 }
 0x200   :  { %1554 = vmatprep.subr.bf16.mxu0 %v1899_v9 }
 0x201   :  { %1588 = vmatpush3.bf16.msra.mxu1 %v2044_v42 }
 0x202   :  { %1590 = vmatprep.subr.bf16.mxu1 %v2046_v44 }
 0x203   :  { %1556 = vmatpush3.bf16.msra.mxu0 %v1909_v12  ;;  %v770_v12 = vsub.s32 3, %v757_v43 }
 0x204   :  { %1558 = vmatprep.subr.bf16.mxu0 %v1917_v15 }
 0x205   :  { %1592 = vmatpush3.bf16.msra.mxu1 %v2064_v53  ;;  %v2140_v31 = vrot.slane %v754_v49, %v770_v12 }
 0x207   :  { %1560 = vmatpush3.bf16.msra.mxu0 %v2059_v50 }
 0x272   :  { %v541_v44 = vpop.xlane.xlu1 %540 }
 0x273   :  { %v537_v55 = vpop.xlane.xlu0 %536 }
 0x276   :  { %v543_v46 = vpop.xlane.xlu1 %542 }
 0x278   :  { %v539_v32 = vpop.xlane.xlu0 %538 }
 0x2b8   :  { %v610_v58 = vpop.f32.mrb[8].mxu0 }
 0x2b9   :  { %v722_v0 = vmul.f32 2.0, %v610_v58  ;;  %v699_v6 = vpop.f32.mrb[8].mxu1  ;;  %v612_v9 = vpop.f32.mrb[9].mxu0 }
 0x2ba   :  { %v724_v15 = vmul.f32 2.0, %v699_v6  ;;  %v723_v59 = vmul.f32 2.0, %v612_v9  ;;  %v701_v5 = vpop.f32.mrb[9].mxu1 }
 0x2bb   :  { %v738_v7 = vsub.f32 %v537_v55, %v722_v0  ;;  %v725_v14 = vmul.f32 2.0, %v701_v5 }
 0x2bc   :  { %v739_v21 = vsub.f32 %v537_v55, %v723_v59  ;;  %v616_v22 = vpop.f32.mrb[10].mxu0  ;;  %v740_v27 = vsub.f32 %v537_v55, %v724_v15 }
 0x2bd   :  { %v2138_v26 = vadd.f32 %v2131_v3, %v738_v7  ;;  %v726_v28 = vmul.f32 2.0, %v616_v22  ;;  %v705_v29 = vpop.f32.mrb[10].mxu1  ;;  %v618_v30 = vpop.f32.mrb[11].mxu0  ;;  %v741_v34 = vsub.f32 %v537_v55, %v725_v14 }
 0x2be   :  { %v2143_v33 = vadd.f32 %v2133_v62, %v739_v21  ;;  %v728_v36 = vmul.f32 2.0, %v705_v29  ;;  %v727_v37 = vmul.f32 2.0, %v618_v30  ;;  %v707_v38 = vpop.f32.mrb[11].mxu1  ;;  %v2148_v50 = vadd.f32 %v2135_v16, %v740_v27 }
 0x2bf   :  { %v742_v41 = vsub.f32 %v539_v32, %v726_v28  ;;  %v729_v42 = vmul.f32 2.0, %v707_v38  ;;  %v2157_v39 = vadd.f32 %v2140_v31, %v741_v34 }
 0x2c0   :  { %v743_v45 = vsub.f32 %v539_v32, %v727_v37  ;;  %v622_v47 = vpop.f32.mrb[12].mxu0  ;;  %v792_v48 = vmin.f32 %v2138_v26, %v2143_v33  ;;  %v744_v53 = vsub.f32 %v539_v32, %v728_v36 }
 0x2c1   :  { %v2151_v51 = vadd.f32 %v2131_v3, %v742_v41  ;;  %v730_v54 = vmul.f32 2.0, %v622_v47  ;;  %v711_v56 = vpop.f32.mrb[12].mxu1  ;;  %v624_v57 = vpop.f32.mrb[13].mxu0  ;;  %v745_v2 = vsub.f32 %v539_v32, %v729_v42 }
 0x2c2   :  { %v2154_v60 = vadd.f32 %v2133_v62, %v743_v45  ;;  %v732_v63 = vmul.f32 2.0, %v711_v56  ;;  %v731_v35 = vmul.f32 2.0, %v624_v57  ;;  %v713_v1 = vpop.f32.mrb[13].mxu1  ;;  %v793_v10 = vmin.f32 %v792_v48, %v2148_v50 }
 0x2c3   :  { %v746_v4 = vsub.f32 %v541_v44, %v730_v54  ;;  %v733_v8 = vmul.f32 2.0, %v713_v1  ;;  %v2163_v19 = vadd.f32 %v2135_v16, %v744_v53  ;;  %v783_v9 = vadd.f32 %v2140_v31, %v745_v2 }
 0x2c4   :  { %v748_v11 = vsub.f32 %v541_v44, %v732_v63  ;;  %v747_v13 = vsub.f32 %v541_v44, %v731_v35  ;;  %v628_v17 = vpop.f32.mrb[14].mxu0  ;;  %v797_v18 = vmin.f32 %v2151_v51, %v2154_v60  ;;  %v794_v43 = vmin.f32 %v793_v10, %v2157_v39 }
 0x2c5   :  { %v2166_v20 = vadd.f32 %v2131_v3, %v746_v4  ;;  %v734_v23 = vmul.f32 2.0, %v628_v17  ;;  %v717_v24 = vpop.f32.mrb[14].mxu1  ;;  %v630_v25 = vpop.f32.mrb[15].mxu0  ;;  %v749_v52 = vsub.f32 %v541_v44, %v733_v8 }
 0x2c6   :  { %v785_v49 = vadd.f32 %v2133_v62, %v747_v13  ;;  %v736_v55 = vmul.f32 2.0, %v717_v24  ;;  %v735_v58 = vmul.f32 2.0, %v630_v25  ;;  %v719_v61 = vpop.f32.mrb[15].mxu1  ;;  %795 = vmin.xlane.f32.xlu0 %v794_v43  ;;  %v798_v12 = vmin.f32 %v797_v18, %v2163_v19 }
 0x2c7   :  { %v750_v0 = vsub.f32 %v543_v46, %v734_v23  ;;  %v737_v6 = vmul.f32 2.0, %v719_v61  ;;  %v786_v15 = vadd.f32 %v2135_v16, %v748_v11  ;;  %v787_v28 = vadd.f32 %v2140_v31, %v749_v52 }
 0x2c8   :  { %v752_v59 = vsub.f32 %v543_v46, %v736_v55  ;;  %v751_v5 = vsub.f32 %v543_v46, %v735_v58  ;;  %v802_v7 = vmin.f32 %v2166_v20, %v785_v49  ;;  %v799_v21 = vmin.f32 %v798_v12, %v783_v9 }
 0x2c9   :  { %v788_v14 = vadd.f32 %v2131_v3, %v750_v0  ;;  %v753_v27 = vsub.f32 %v543_v46, %v737_v6 }
 0x2ca   :  { %v789_v22 = vadd.f32 %v2133_v62, %v751_v5  ;;  %v803_v29 = vmin.f32 %v802_v7, %v786_v15  ;;  %800 = vmin.xlane.f32.xlu1 %v799_v21  ;;  %v2178_v30 = vadd.f32 %v2135_v16, %v752_v59  ;;  %v2186_v62 = vand.u32 127, %v756_v40 }
 0x2cb   :  { %v2181_v36 = vadd.f32 %v2140_v31, %v753_v27 }
 0x2cc   :  { %v804_v32 = vmin.f32 %v803_v29, %v787_v28  ;;  %v807_v34 = vmin.f32 %v788_v14, %v789_v22  ;;  %v2189_v38 = vadd.s32 128, %v2186_v62  ;;  %v2192_v16 = vadd.s32 256, %v2186_v62 }
 0x2cd   :  { %v2200_v40 = vadd.s32 384, %v2186_v62 }
 0x2ce   :  { %805 = vmin.xlane.f32.xlu0 %v804_v32  ;;  %v808_v37 = vmin.f32 %v807_v34, %v2178_v30 }
 0x2d0   :  { %v809_v3 = vmin.f32 %v808_v37, %v2181_v36 }
 0x2d2   :  { %810 = vmin.xlane.f32.xlu1 %v809_v3 }
 0x353   :  { %v796_v41 = vpop.xlane.xlu0 %795 }
 0x354   :  { %vm817_vm1 = vcmp.eq.f32.partialorder %v2138_v26, %v796_v41  ;;  %vm818_vm2 = vcmp.eq.f32.partialorder %v2143_v33, %v796_v41  ;;  %vm819_vm3 = vcmp.eq.f32.partialorder %v2148_v50, %v796_v41  ;;  %vm820_vm5 = vcmp.eq.f32.partialorder %v2157_v39, %v796_v41 }
 0x355   :  { %v833_v31 = vsel %vm817_vm1, %v2186_v62, 2147483647  ;;  %v834_v42 = vsel %vm818_vm2, %v2189_v38, 2147483647  ;;  %v835_v47 = vsel %vm819_vm3, %v2192_v16, 2147483647 }
 0x356   :  { %vm849_vm4 = vcmp.lt.s32.totalorder %v833_v31, %v834_v42  ;;  %v836_v50 = vsel %vm820_vm5, %v2200_v40, 2147483647 }
 0x357   :  { %v801_v44 = vpop.xlane.xlu1 %800  ;;  %v850_v45 = vsel %vm849_vm4, %v833_v31, %v834_v42 }
 0x358   :  { %vm821_vm6 = vcmp.eq.f32.partialorder %v2151_v51, %v801_v44  ;;  %vm822_vm7 = vcmp.eq.f32.partialorder %v2154_v60, %v801_v44  ;;  %vm823_vm8 = vcmp.eq.f32.partialorder %v2163_v19, %v801_v44  ;;  %vm851_vm9 = vcmp.lt.s32.totalorder %v850_v45, %v835_v47 }
 0x359   :  { %v837_v26 = vsel %vm821_vm6, %v2186_v62, 2147483647  ;;  %v838_v33 = vsel %vm822_vm7, %v2189_v38, 2147483647  ;;  %v852_v53 = vsel %vm851_vm9, %v850_v45, %v835_v47  ;;  %vm824_vm11 = vcmp.eq.f32.partialorder %v783_v9, %v801_v44 }
 0x35a   :  { %vm869_vm10 = vcmp.lt.s32.totalorder %v837_v26, %v838_v33  ;;  %v839_v54 = vsel %vm823_vm8, %v2192_v16, 2147483647  ;;  %vm853_vm15 = vcmp.lt.s32.totalorder %v852_v53, %v836_v50  ;;  %v840_v1 = vsel %vm824_vm11, %v2200_v40, 2147483647 }
 0x35b   :  { %v806_v48 = vpop.xlane.xlu0 %805  ;;  %v854_v57 = vsel %vm853_vm15, %v852_v53, %v836_v50  ;;  %v870_v60 = vsel %vm869_vm10, %v837_v26, %v838_v33  ;;  %v1628_v45 = vmov 1.0  }
 0x35c   :  { %vm825_vm12 = vcmp.eq.f32.partialorder %v2166_v20, %v806_v48  ;;  %vm826_vm13 = vcmp.eq.f32.partialorder %v785_v49, %v806_v48  ;;  %vm827_vm14 = vcmp.eq.f32.partialorder %v786_v15, %v806_v48  ;;  %vm828_vm0 = vcmp.eq.f32.partialorder %v787_v28, %v806_v48 }
 0x35d   :  { %v841_v51 = vsel %vm825_vm12, %v2186_v62, 2147483647  ;;  %v842_v56 = vsel %vm826_vm13, %v2189_v38, 2147483647  ;;  %v856_v35 = vshra.s32 %v854_v57, 16  ;;  %vm871_vm2 = vcmp.lt.s32.totalorder %v870_v60, %v839_v54 }
 0x35e   :  { %vm889_vm1 = vcmp.lt.s32.totalorder %v841_v51, %v842_v56  ;;  %v843_v2 = vsel %vm827_vm14, %v2192_v16, 2147483647  ;;  %v844_v11 = vsel %vm828_vm0, %v2200_v40, 2147483647  ;;  %v872_v13 = vsel %vm871_vm2, %v870_v60, %v839_v54 }
 0x35f   :  { %v811_v63 = vpop.xlane.xlu1 %810  ;;  %v890_v39 = vsel %vm889_vm1, %v841_v51, %v842_v56  ;;  %v858_v10 = vcvt.s32.f32 %v856_v35  ;;  %vm873_vm9 = vcmp.lt.s32.totalorder %v872_v13, %v840_v1  ;;  %v855_v0 = vand.u32 65535, %v854_v57 }
 0x360   :  { %vm829_vm3 = vcmp.eq.f32.partialorder %v788_v14, %v811_v63  ;;  %vm830_vm4 = vcmp.eq.f32.partialorder %v789_v22, %v811_v63  ;;  %vm831_vm5 = vcmp.eq.f32.partialorder %v2178_v30, %v811_v63  ;;  %vm832_vm6 = vcmp.eq.f32.partialorder %v2181_v36, %v811_v63 }
 0x361   :  { %v845_v4 = vsel %vm829_vm3, %v2186_v62, 2147483647  ;;  %v846_v8 = vsel %vm830_vm4, %v2189_v38, 2147483647  ;;  %vm891_vm8 = vcmp.lt.s32.totalorder %v890_v39, %v843_v2  ;;  %v847_v17 = vsel %vm831_vm5, %v2192_v16, 2147483647  ;;  %859 = vmin.xlane.f32.xlu0 %v858_v10 }
 0x362   :  { %vm909_vm7 = vcmp.lt.s32.totalorder %v845_v4, %v846_v8  ;;  %v892_v18 = vsel %vm891_vm8, %v890_v39, %v843_v2  ;;  %v874_v20 = vsel %vm873_vm9, %v872_v13, %v840_v1  ;;  %v848_v25 = vsel %vm832_vm6, %v2200_v40, 2147483647 }
 0x363   :  { %v910_v19 = vsel %vm909_vm7, %v845_v4, %v846_v8  ;;  %vm893_vm10 = vcmp.lt.s32.totalorder %v892_v18, %v844_v11  ;;  %v876_v23 = vshra.s32 %v874_v20, 16  ;;  %v857_v9 = vcvt.s32.f32 %v855_v0 }
 0x364   :  { %vm911_vm11 = vcmp.lt.s32.totalorder %v910_v19, %v847_v17  ;;  %v894_v24 = vsel %vm893_vm10, %v892_v18, %v844_v11  ;;  %v875_v15 = vand.u32 65535, %v874_v20 }
 0x365   :  { %v912_v43 = vsel %vm911_vm11, %v910_v19, %v847_v17  ;;  %v896_v46 = vshra.s32 %v894_v24, 16  ;;  %v878_v49 = vcvt.s32.f32 %v876_v23  ;;  %v895_v59 = vand.u32 65535, %v894_v24 }
 0x366   :  { %vm913_vm12 = vcmp.lt.s32.totalorder %v912_v43, %v848_v25  ;;  %v877_v7 = vcvt.s32.f32 %v875_v15 }
 0x367   :  { %v914_v52 = vsel %vm913_vm12, %v912_v43, %v848_v25  ;;  %v898_v55 = vcvt.s32.f32 %v896_v46  ;;  %879 = vmin.xlane.f32.xlu1 %v878_v49  ;;  %v897_v22 = vcvt.s32.f32 %v895_v59 }
 0x368   :  { %v916_v58 = vshra.s32 %v914_v52, 16  ;;  %v915_v14 = vand.u32 65535, %v914_v52 }
 0x369   :  { %899 = vmin.xlane.f32.xlu0 %v898_v55 }
 0x36a   :  { %v918_v61 = vcvt.s32.f32 %v916_v58  ;;  %v917_v30 = vcvt.s32.f32 %v915_v14 }
 0x36c   :  { %919 = vmin.xlane.f32.xlu1 %v918_v61 }
 0x3ee   :  { %v860_v6 = vpop.xlane.xlu0 %859 }
 0x3ef   :  { %vm861_vm13 = vcmp.eq.f32.partialorder %v858_v10, %v860_v6  ;;  %v866_v34 = vcvt.f32.s32 %v860_v6 }
 0x3f0   :  { %v862_v12 = vsel %vm861_vm13, %v857_v9, inf }
 0x3f1   :  { %863 = vmin.xlane.f32.xlu0 %v862_v12  ;;  %v867_v37 = vshll.u32 %v866_v34, 16 }
 0x3f4   :  { %v880_v5 = vpop.xlane.xlu1 %879 }
 0x3f5   :  { %vm881_vm14 = vcmp.eq.f32.partialorder %v878_v49, %v880_v5  ;;  %v886_v41 = vcvt.f32.s32 %v880_v5 }
 0x3f6   :  { %v900_v21 = vpop.xlane.xlu0 %899  ;;  %v882_v27 = vsel %vm881_vm14, %v877_v7, inf }
 0x3f7   :  { %vm901_vm15 = vcmp.eq.f32.partialorder %v898_v55, %v900_v21  ;;  %883 = vmin.xlane.f32.xlu1 %v882_v27  ;;  %v906_v42 = vcvt.f32.s32 %v900_v21  ;;  %v887_v47 = vshll.u32 %v886_v41, 16 }
 0x3f8   :  { %v902_v28 = vsel %vm901_vm15, %v897_v22, inf }
 0x3f9   :  { %903 = vmin.xlane.f32.xlu0 %v902_v28  ;;  %v920_v29 = vpop.xlane.xlu1 %919  ;;  %v907_v48 = vshll.u32 %v906_v42, 16 }
 0x3fa   :  { %vm921_vm0 = vcmp.eq.f32.partialorder %v918_v61, %v920_v29  ;;  %v926_v50 = vcvt.f32.s32 %v920_v29 }
 0x3fb   :  { %v922_v32 = vsel %vm921_vm0, %v917_v30, inf }
 0x3fc   :  { %923 = vmin.xlane.f32.xlu1 %v922_v32  ;;  %v927_v57 = vshll.u32 %v926_v50, 16 }
 0x47e   :  { %v864_v36 = vpop.xlane.xlu0 %863 }
 0x47f   :  { %v865_v3 = vcvt.f32.s32 %v864_v36 }
 0x481   :  { %v868_v31 = vadd.s32 %v867_v37, %v865_v3 }
 0x483   :  { %vm930_vm1 = vcmp.eq.s32.totalorder %v2189_v38, %v868_v31  ;;  %vm932_vm2 = vcmp.eq.s32.totalorder %v2200_v40, %v868_v31  ;;  %vm929_vm3 = vcmp.eq.s32.totalorder %v2186_v62, %v868_v31  ;;  %vm931_vm4 = vcmp.eq.s32.totalorder %v2192_v16, %v868_v31 }
 0x484   :  { %v884_v44 = vpop.xlane.xlu1 %883  ;;  %1211 = vmatprep.mubr.msk.f32.mxu0 %vm930_vm1, %v1628_v45  ;;  %1219 = vmatprep.mubr.msk.f32.mxu1 %vm932_vm2, %v1628_v45 }
 0x485   :  { %v885_v26 = vcvt.f32.s32 %v884_v44  ;;  %1212 = vmatmul.mubr.msk.f32.vlgmr.msra.gmra.mrb[16].mxu0 %vm929_vm3, %v1628_v45  ;;  %1220 = vmatmul.mubr.msk.f32.vlgmr.msra.gmra.mrb[16].mxu1 %vm931_vm4, %v1628_v45 }
 0x486   :  { %v904_v33 = vpop.xlane.xlu0 %903 }
 0x487   :  { %v905_v53 = vcvt.f32.s32 %v904_v33  ;;  %v888_v54 = vadd.s32 %v887_v47, %v885_v26 }
 0x489   :  { %v908_v51 = vadd.s32 %v907_v48, %v905_v53  ;;  %v924_v56 = vpop.xlane.xlu1 %923  ;;  %vm934_vm5 = vcmp.eq.s32.totalorder %v2189_v38, %v888_v54  ;;  %vm936_vm6 = vcmp.eq.s32.totalorder %v2200_v40, %v888_v54  ;;  %vm933_vm7 = vcmp.eq.s32.totalorder %v2186_v62, %v888_v54 }
 0x48a   :  { %vm935_vm8 = vcmp.eq.s32.totalorder %v2192_v16, %v888_v54  ;;  %1213 = vmatprep.mubr.msk.f32.mxu0 %vm934_vm5, %v1628_v45  ;;  %1221 = vmatprep.mubr.msk.f32.mxu1 %vm936_vm6, %v1628_v45  ;;  %v925_v60 = vcvt.f32.s32 %v924_v56 }
 0x48b   :  { %vm938_vm9 = vcmp.eq.s32.totalorder %v2189_v38, %v908_v51  ;;  %vm940_vm10 = vcmp.eq.s32.totalorder %v2200_v40, %v908_v51  ;;  %1214 = vmatmul.mubr.msk.f32.gmra.mrb[18].mxu0 %vm933_vm7, %v1628_v45  ;;  %1222 = vmatmul.mubr.msk.f32.gmra.mrb[18].mxu1 %vm935_vm8, %v1628_v45  ;;  %vm937_vm11 = vcmp.eq.s32.totalorder %v2186_v62, %v908_v51 }
 0x48c   :  { %v928_v63 = vadd.s32 %v927_v57, %v925_v60  ;;  %1215 = vmatprep.mubr.msk.f32.mxu0 %vm938_vm9, %v1628_v45  ;;  %1223 = vmatprep.mubr.msk.f32.mxu1 %vm940_vm10, %v1628_v45  ;;  %vm939_vm12 = vcmp.eq.s32.totalorder %v2192_v16, %v908_v51 }
 0x48e   :  { %vm942_vm13 = vcmp.eq.s32.totalorder %v2189_v38, %v928_v63  ;;  %vm944_vm14 = vcmp.eq.s32.totalorder %v2200_v40, %v928_v63  ;;  %vm941_vm15 = vcmp.eq.s32.totalorder %v2186_v62, %v928_v63  ;;  %vm943_vm0 = vcmp.eq.s32.totalorder %v2192_v16, %v928_v63 }
 0x48f   :  { %1216 = vmatmul.mubr.msk.f32.gmra.mrb[20].mxu0 %vm937_vm11, %v1628_v45  ;;  %1224 = vmatmul.mubr.msk.f32.gmra.mrb[20].mxu1 %vm939_vm12, %v1628_v45 }
 0x490   :  { %1217 = vmatprep.mubr.msk.f32.mxu0 %vm942_vm13, %v1628_v45  ;;  %1225 = vmatprep.mubr.msk.f32.mxu1 %vm944_vm14, %v1628_v45 }
 0x493   :  { %1218 = vmatmul.mubr.msk.f32.gmra.mrb[22].mxu0 %vm941_vm15, %v1628_v45  ;;  %1226 = vmatmul.mubr.msk.f32.gmra.mrb[22].mxu1 %vm943_vm0, %v1628_v45 }
 0x558   :  { %v1381_v35 = vpop.f32.mrb[16].mxu0  ;;  %v1425_v1 = vpop.f32.mrb[16].mxu1 }
 0x559   :  { %v1382_v39 = vpop.f32.mrb[17].mxu0  ;;  %v1426_v2 = vpop.f32.mrb[17].mxu1 }
 0x55a   :  { %v1383_v4 = vadd.f32 %v1382_v39, %v1381_v35  ;;  %v1427_v8 = vadd.f32 %v1426_v2, %v1425_v1 }
 0x55c   :  { %v1129_v10 = vadd.f32 %v1427_v8, %v1383_v4 }
 0x55e   :  { %1147 = vst [vmem:[%s2261_s9] sm:$0xff] %v1129_v10  ;;  %v1384_v38 = vpop.f32.mrb[18].mxu0  ;;  %v1428_v40 = vpop.f32.mrb[18].mxu1 }
 0x55f   :  { %v1385_v11 = vpop.f32.mrb[19].mxu0  ;;  %v1429_v13 = vpop.f32.mrb[19].mxu1 }
 0x560   :  { %v1386_v62 = vadd.f32 %v1385_v11, %v1384_v38  ;;  %v1430_v17 = vadd.f32 %v1429_v13, %v1428_v40 }
 0x562   :  { %v1134_v16 = vadd.f32 %v1430_v17, %v1386_v62  ;;  %v1387_v18 = vpop.f32.mrb[20].mxu0  ;;  %v1431_v19 = vpop.f32.mrb[20].mxu1 }
 0x563   :  { %v1388_v20 = vpop.f32.mrb[21].mxu0  ;;  %v1432_v23 = vpop.f32.mrb[21].mxu1 }
 0x564   :  { %1148 = vst [vmem:[%s2261_s9 + $0x8] sm:$0xff] %v1134_v16  ;;  %v1389_v24 = vadd.f32 %v1388_v20, %v1387_v18  ;;  %v1433_v25 = vadd.f32 %v1432_v23, %v1431_v19 }
 0x566   :  { %v1139_v43 = vadd.f32 %v1433_v25, %v1389_v24  ;;  %v1390_v46 = vpop.f32.mrb[22].mxu0  ;;  %v1434_v49 = vpop.f32.mrb[22].mxu1 }
 0x567   :  { %v1391_v52 = vpop.f32.mrb[23].mxu0  ;;  %v1435_v55 = vpop.f32.mrb[23].mxu1 }
 0x568   :  { %1149 = vst [vmem:[%s2261_s9 + $0x10] sm:$0xff] %v1139_v43  ;;  %v1392_v58 = vadd.f32 %v1391_v52, %v1390_v46  ;;  %v1436_v61 = vadd.f32 %v1435_v55, %v1434_v49 }
 0x56a   :  { %v1144_v0 = vadd.f32 %v1436_v61, %v1392_v58 }
 0x56c   :  { %1150 = vst [vmem:[%s2261_s9 + $0x18] sm:$0xff] %v1144_v0 }

// kernel: vqvae_forward.13
= control target key start
LH: loop header
LB: loop body
LE: loop exit
PB: predicated region body
PF: predicated region fallthrough
CT: control target
= control target key end

     0   :  { %vm213_vm0 = vcmask 261120   ;;  %s800_s1 = inlined_call_operand.vmem [shape: bf16[288,128], index: 1, kind: input, shape index: {}]   ;;  %s801_s0 = inlined_call_operand.vmem [shape: bf16[32,288], index: 0, kind: input, shape index: {}]   ;;  %s802_s3 = inlined_call_operand.vmem [shape: bf16[128,128], index: 3, kind: input, shape index: {}]   ;;  %s803_s2 = inlined_call_operand.vmem [shape: f32[1,128], index: 2, kind: input, shape index: {}]   ;;  %s804_s5 = inlined_call_operand.vmem [shape: f32[32,128], index: 5, kind: input, shape index: {}]   ;;  %s805_s4 = inlined_call_operand.vmem [shape: f32[1,128], index: 4, kind: input, shape index: {}]   ;;  %s806_s6 = inlined_call_operand.vmem [shape: bf16[32,128], index: 6, kind: output, shape index: {}]  }
   0x1   :  { %v609_v0 = vld [vmem:[%s800_s1 + $0x40] sm:$0xff]   ;;  %v611_v2 = vld [vmem:[%s800_s1 + $0x48] sm:$0xff]   ;;  %v613_v4 = vld [vmem:[%s800_s1 + $0x50] sm:$0xff]  }
   0x2   :  { %v610_v1 = vld [vmem:[%s800_s1] sm:$0xff]   ;;  %539 = vmatprep.subr.bf16.mxu0 %v609_v0  ;;  %v612_v3 = vld [vmem:[%s800_s1 + $0x8] sm:$0xff]   ;;  %v614_v5 = vld [vmem:[%s800_s1 + $0x10] sm:$0xff]  }
   0x3   :  { %540 = vmatpush3.bf16.msra.mxu0 %v610_v1  ;;  %v615_v6 = vld [vmem:[%s800_s1 + $0x58] sm:$0xff]   ;;  %v617_v8 = vld [vmem:[%s800_s1 + $0x60] sm:$0xff]   ;;  %v619_v11 = vld [vmem:[%s800_s1 + $0x68] sm:$0xff]  }
   0x4   :  { %541 = vmatprep.subr.bf16.mxu0 %v611_v2  ;;  %v616_v7 = vld [vmem:[%s800_s1 + $0x18] sm:$0xff]   ;;  %v618_v9 = vld [vmem:[%s800_s1 + $0x20] sm:$0xff]   ;;  %v620_v12 = vld [vmem:[%s800_s1 + $0x28] sm:$0xff]  }
   0x5   :  { %v624_v10 = vld [vmem:[%s800_s1 + $0x80] sm:$0xff]   ;;  %v621_v13 = vld [vmem:[%s800_s1 + $0x70] sm:$0xff]   ;;  %v629_v15 = vld [vmem:[%s800_s1 + $0x88] sm:$0xff]  }
   0x6   :  { %581 = vmatprep.subr.bf16.mxu1 %v624_v10  ;;  %v628_v14 = vld [vmem:[%s801_s0 + $0x4] ss:$12 sps:$4 sm:$0xff]   ;;  %v630_v16 = vld [vmem:[%s801_s0 + $0x8] ss:$12 sps:$4 sm:$0xff]   ;;  %v631_v17 = vld [vmem:[%s801_s0 + $0x20] ss:$12 sps:$4 sm:$0xff]  }
   0x7   :  { %542 = vmatpush3.bf16.msra.mxu0 %v612_v3  ;;  %582 = vmatpush3.bf16.msra.mxu1 %v624_v10  ;;  %v622_v18 = vld [vmem:[%s800_s1 + $0x30] sm:$0xff]   ;;  %v623_v19 = vld [vmem:[%s800_s1 + $0x78] sm:$0xff]   ;;  %v635_v20 = vld [vmem:[%s802_s3] sm:$0xff]  }
   0x8   :  { %543 = vmatprep.subr.bf16.mxu0 %v613_v4  ;;  %252 = vmatprep.mubr.bf16.mxu0 %v628_v14  ;;  %v636_v21 = vld [vmem:[%s802_s3 + $0x8] sm:$0xff]   ;;  %v625_v22 = vld [vmem:[%s800_s1 + $0x38] sm:$0xff]   ;;  %v637_v23 = vld [vmem:[%s802_s3 + $0x10] sm:$0xff]  }
   0x9   :  { %583 = vmatprep.subr.bf16.mxu1 %v629_v15  ;;  %585 = vmatprep.mubr.msk.bf16.mxu1 %vm213_vm0, %v630_v16  ;;  %v626_v24 = vld [vmem:[%s801_s0] ss:$12 sps:$4 sm:$0xff]   ;;  %v632_v25 = vld [vmem:[%s801_s0 + $0x1c] ss:$12 sps:$4 sm:$0xff]   ;;  %v634_v26 = vld [vmem:[%s801_s0 + $0x18] ss:$12 sps:$4 sm:$0xff]  }
   0xa   :  { %v638_v27 = vld [vmem:[%s802_s3 + $0x18] sm:$0xff]   ;;  %v639_v28 = vld [vmem:[%s802_s3 + $0x20] sm:$0xff]   ;;  %v640_v29 = vld [vmem:[%s802_s3 + $0x28] sm:$0xff]  }
   0xb   :  { %544 = vmatpush3.bf16.msra.mxu0 %v614_v5  ;;  %584 = vmatpush3.bf16.msra.mxu1 %v629_v15  ;;  %v641_v30 = vld [vmem:[%s802_s3 + $0x30] sm:$0xff]   ;;  %v642_v31 = vld [vmem:[%s802_s3 + $0x38] sm:$0xff]   ;;  %v484_v38 = vld [vmem:[%s803_s2] ss:$0 sm:$0xff] }
   0xc   :  { %545 = vmatprep.subr.bf16.mxu0 %v615_v6  ;;  %589 = vmatprep.subr.bf16.mxu1 %v635_v20  ;;  %v439_v63 = vld [vmem:[%s804_s5 + $0x10] sm:$0xff]  ;;  %v437_v0 = vld [vmem:[%s804_s5] sm:$0xff]  ;;  %v440_v3 = vld [vmem:[%s804_s5 + $0x18] sm:$0xff] }
   0xd   :  { %v519_v2 = vld [vmem:[%s805_s4] ss:$0 sm:$0xff]  ;;  %v438_v6 = vld [vmem:[%s804_s5 + $0x8] sm:$0xff] }
   0xe   :  { %586 = vmatmul.mubr.msk.bf16.vlgmr.msra.gmra.mrb[0].mxu1 %vm213_vm0, %v631_v17 }
   0xf   :  { %546 = vmatpush3.bf16.msra.mxu0 %v616_v7  ;;  %590 = vmatpush3.bf16.msra.mxu1 %v635_v20 }
  0x10   :  { %547 = vmatprep.subr.bf16.mxu0 %v617_v8  ;;  %591 = vmatprep.subr.bf16.mxu1 %v636_v21 }
  0x13   :  { %548 = vmatpush3.bf16.msra.mxu0 %v618_v9  ;;  %592 = vmatpush3.bf16.msra.mxu1 %v636_v21 }
  0x14   :  { %549 = vmatprep.subr.bf16.mxu0 %v619_v11  ;;  %593 = vmatprep.subr.bf16.mxu1 %v637_v23 }
  0x17   :  { %550 = vmatpush3.bf16.msra.mxu0 %v620_v12  ;;  %594 = vmatpush3.bf16.msra.mxu1 %v637_v23 }
  0x18   :  { %551 = vmatprep.subr.bf16.mxu0 %v621_v13  ;;  %595 = vmatprep.subr.bf16.mxu1 %v638_v27 }
  0x1b   :  { %552 = vmatpush3.bf16.msra.mxu0 %v622_v18  ;;  %596 = vmatpush3.bf16.msra.mxu1 %v638_v27 }
  0x1c   :  { %553 = vmatprep.subr.bf16.mxu0 %v623_v19  ;;  %597 = vmatprep.subr.bf16.mxu1 %v639_v28 }
  0x1f   :  { %554 = vmatpush3.bf16.msra.mxu0 %v625_v22  ;;  %598 = vmatpush3.bf16.msra.mxu1 %v639_v28 }
  0x20   :  { %599 = vmatprep.subr.bf16.mxu1 %v640_v29 }
  0x22   :  { %253 = vmatmul.mubr.bf16.vlgmr.msra.gmra.mrb[0].mxu0 %v626_v24 }
  0x23   :  { %260 = vmatprep.mubr.bf16.mxu0 %v632_v25  ;;  %600 = vmatpush3.bf16.msra.mxu1 %v640_v29 }
  0x24   :  { %601 = vmatprep.subr.bf16.mxu1 %v641_v30 }
  0x27   :  { %602 = vmatpush3.bf16.msra.mxu1 %v641_v30 }
  0x28   :  { %603 = vmatprep.subr.bf16.mxu1 %v642_v31 }
  0x2a   :  { %261 = vmatmul.mubr.bf16.gmra.mrb[4].mxu0 %v634_v26 }
  0x2b   :  { %604 = vmatpush3.bf16.msra.mxu1 %v642_v31 }
  0xe1   :  { %v587_v32 = vpop.f32.mrb[0].mxu1 }
  0xe2   :  { %v303_v33 = vpop.f32.mrb[1].mxu1 }
  0xe3   :  { %v588_v34 = vpop.f32.mrb[2].mxu1 }
  0xe4   :  { %v306_v35 = vpop.f32.mrb[3].mxu1 }
  0xf5   :  { %v555_v36 = vpop.f32.mrb[0].mxu0 }
  0xf6   :  { %v556_v37 = vpop.f32.mrb[1].mxu0 }
  0xf7   :  { %v557_v39 = vadd.f32 %v556_v37, %v555_v36  ;;  %v558_v40 = vpop.f32.mrb[2].mxu0 }
  0xf8   :  { %v559_v41 = vpop.f32.mrb[3].mxu0 }
  0xf9   :  { %v560_v42 = vadd.f32 %v559_v41, %v558_v40  ;;  %v255_v43 = vadd.f32 %v557_v39, %v484_v38 }
  0xfb   :  { %v304_v44 = vadd.f32 %v303_v33, %v255_v43  ;;  %v258_v45 = vadd.f32 %v560_v42, %v484_v38 }
  0xfd   :  { %v307_v46 = vadd.f32 %v306_v35, %v258_v45  ;;  %v561_v47 = vpop.f32.mrb[4].mxu0  ;;  %v318_v49 = vmax.f32 %v304_v44, 0.0 }
  0xfe   :  { %v562_v48 = vpop.f32.mrb[5].mxu0 }
  0xff   :  { %v319_v50 = vmax.f32 %v307_v46, 0.0  ;;  %v563_v51 = vadd.f32 %v562_v48, %v561_v47  ;;  %v564_v52 = vpop.f32.mrb[6].mxu0 }
 0x100   :  { %v565_v53 = vpop.f32.mrb[7].mxu0 }
 0x101   :  { %v322_v54 = vpack.c.bf16 %v319_v50, %v318_v49  ;;  %v263_v55 = vadd.f32 %v563_v51, %v484_v38  ;;  %v566_v56 = vadd.f32 %v565_v53, %v564_v52 }
 0x103   :  { %v312_v57 = vadd.f32 %v587_v32, %v263_v55  ;;  %v266_v58 = vadd.f32 %v566_v56, %v484_v38  ;;  %605 = vmatprep.mubr.bf16.mxu1 %v322_v54 }
 0x105   :  { %v315_v59 = vadd.f32 %v588_v34, %v266_v58  ;;  %v320_v60 = vmax.f32 %v312_v57, 0.0 }
 0x107   :  { %v321_v61 = vmax.f32 %v315_v59, 0.0 }
 0x109   :  { %v323_v62 = vpack.c.bf16 %v321_v61, %v320_v60 }
 0x10b   :  { %606 = vmatmul.mubr.bf16.vlgmr.msra.gmra.mrb[4].mxu1 %v323_v62 }
 0x1de   :  { %v607_v1 = vpop.f32.mrb[4].mxu1 }
 0x1df   :  { %v443_v4 = vadd.f32 %v607_v1, %v439_v63  ;;  %v422_v5 = vpop.f32.mrb[5].mxu1 }
 0x1e0   :  { %v441_v7 = vadd.f32 %v437_v0, %v422_v5  ;;  %v608_v8 = vpop.f32.mrb[6].mxu1 }
 0x1e1   :  { %v454_v9 = vadd.f32 %v519_v2, %v443_v4  ;;  %v444_v10 = vadd.f32 %v608_v8, %v440_v3  ;;  %v425_v11 = vpop.f32.mrb[7].mxu1 }
 0x1e2   :  { %v452_v12 = vadd.f32 %v519_v2, %v441_v7  ;;  %v442_v13 = vadd.f32 %v438_v6, %v425_v11 }
 0x1e3   :  { %v455_v14 = vadd.f32 %v519_v2, %v444_v10  ;;  %v458_v16 = vmax.f32 %v454_v9, 0.0 }
 0x1e4   :  { %v453_v15 = vadd.f32 %v519_v2, %v442_v13  ;;  %v456_v18 = vmax.f32 %v452_v12, 0.0 }
 0x1e5   :  { %v459_v17 = vmax.f32 %v455_v14, 0.0 }
 0x1e6   :  { %v457_v19 = vmax.f32 %v453_v15, 0.0 }
 0x1e7   :  { %v536_v20 = vpack.c.bf16 %v459_v17, %v458_v16 }
 0x1e8   :  { %v531_v21 = vpack.c.bf16 %v457_v19, %v456_v18 }
 0x1e9   :  { %538 = vst [vmem:[%s806_s6 + $0x8] sm:$0xff] %v536_v20  }
 0x1ea   :  { %532 = vst [vmem:[%s806_s6] sm:$0xff] %v531_v21  }

// kernel: vqvae_forward.15
= control target key start
LH: loop header
LB: loop body
LE: loop exit
PB: predicated region body
PF: predicated region fallthrough
CT: control target
= control target key end

     0   :  { %vm318_vm0 = vcmask 261120   ;;  %s1003_s1 = inlined_call_operand.vmem [shape: bf16[288,128], index: 1, kind: input, shape index: {}]   ;;  %s1004_s0 = inlined_call_operand.vmem [shape: bf16[128,288], index: 0, kind: input, shape index: {}]   ;;  %s1005_s2 = inlined_call_operand.vmem [shape: f32[1,128], index: 2, kind: input, shape index: {}]   ;;  %s1006_s3 = inlined_call_operand.vmem [shape: f32[128,128], index: 3, kind: output, shape index: {}]  }
   0x1   :  { %v718_v0 = vld [vmem:[%s1003_s1 + $0x40] sm:$0xff]   ;;  %v720_v2 = vld [vmem:[%s1003_s1 + $0x48] sm:$0xff]   ;;  %v722_v4 = vld [vmem:[%s1003_s1 + $0x50] sm:$0xff]  }
   0x2   :  { %v719_v1 = vld [vmem:[%s1003_s1] sm:$0xff]   ;;  %608 = vmatprep.subr.bf16.mxu0 %v718_v0  ;;  %702 = vmatprep.subr.bf16.mxu1 %v718_v0  ;;  %v721_v3 = vld [vmem:[%s1003_s1 + $0x8] sm:$0xff]   ;;  %v723_v5 = vld [vmem:[%s1003_s1 + $0x10] sm:$0xff]  }
   0x3   :  { %609 = vmatpush3.bf16.msra.mxu0 %v719_v1  ;;  %710 = vmatpush3.bf16.msra.mxu1 %v719_v1  ;;  %v724_v6 = vld [vmem:[%s1003_s1 + $0x58] sm:$0xff]   ;;  %v726_v8 = vld [vmem:[%s1003_s1 + $0x60] sm:$0xff]   ;;  %v728_v10 = vld [vmem:[%s1003_s1 + $0x68] sm:$0xff]  }
   0x4   :  { %610 = vmatprep.subr.bf16.mxu0 %v720_v2  ;;  %703 = vmatprep.subr.bf16.mxu1 %v720_v2  ;;  %v725_v7 = vld [vmem:[%s1003_s1 + $0x18] sm:$0xff]   ;;  %v727_v9 = vld [vmem:[%s1003_s1 + $0x20] sm:$0xff]   ;;  %v729_v13 = vld [vmem:[%s1003_s1 + $0x28] sm:$0xff]  }
   0x5   :  { %v736_v11 = vld [vmem:[%s1004_s0 + $0x4] ss:$12 sps:$4 sm:$0xff]   ;;  %v739_v12 = vld [vmem:[%s1004_s0 + $0x94] ss:$12 sps:$4 sm:$0xff]   ;;  %v732_v16 = vld [vmem:[%s1003_s1 + $0x78] sm:$0xff]  }
   0x6   :  { %v730_v14 = vld [vmem:[%s1003_s1 + $0x70] sm:$0xff]   ;;  %375 = vmatprep.mubr.bf16.mxu0 %v736_v11  ;;  %423 = vmatprep.mubr.bf16.mxu1 %v739_v12  ;;  %v733_v17 = vld [vmem:[%s1003_s1 + $0x38] sm:$0xff]   ;;  %v734_v18 = vld [vmem:[%s1004_s0] ss:$12 sps:$4 sm:$0xff]  }
   0x7   :  { %611 = vmatpush3.bf16.msra.mxu0 %v721_v3  ;;  %711 = vmatpush3.bf16.msra.mxu1 %v721_v3  ;;  %v731_v15 = vld [vmem:[%s1003_s1 + $0x30] sm:$0xff]   ;;  %v740_v19 = vld [vmem:[%s1003_s1 + $0x80] sm:$0xff]   ;;  %v741_v21 = vld [vmem:[%s1004_s0 + $0x1c] ss:$12 sps:$4 sm:$0xff]  }
   0x8   :  { %612 = vmatprep.subr.bf16.mxu0 %v722_v4  ;;  %704 = vmatprep.subr.bf16.mxu1 %v722_v4  ;;  %v737_v20 = vld [vmem:[%s1004_s0 + $0x90] ss:$12 sps:$4 sm:$0xff]   ;;  %v743_v22 = vld [vmem:[%s1004_s0 + $0xac] ss:$12 sps:$4 sm:$0xff]   ;;  %v746_v25 = vld [vmem:[%s1004_s0 + $0xa8] ss:$12 sps:$4 sm:$0xff]  }
   0x9   :  { %v747_v23 = vld [vmem:[%s1003_s1 + $0x88] sm:$0xff]   ;;  %v745_v24 = vld [vmem:[%s1004_s0 + $0x18] ss:$12 sps:$4 sm:$0xff]   ;;  %v748_v26 = vld [vmem:[%s1004_s0 + $0x34] ss:$12 sps:$4 sm:$0xff]  }
   0xa   :  { %v750_v27 = vld [vmem:[%s1004_s0 + $0x8] ss:$12 sps:$4 sm:$0xff]   ;;  %v751_v28 = vld [vmem:[%s1004_s0 + $0x30] ss:$12 sps:$4 sm:$0xff]   ;;  %v752_v29 = vld [vmem:[%s1004_s0 + $0x20] ss:$12 sps:$4 sm:$0xff]  }
   0xb   :  { %613 = vmatpush3.bf16.msra.mxu0 %v723_v5  ;;  %712 = vmatpush3.bf16.msra.mxu1 %v723_v5  ;;  %v753_v30 = vld [vmem:[%s1004_s0 + $0x4c] ss:$12 sps:$4 sm:$0xff]   ;;  %v756_v32 = vld [vmem:[%s1004_s0 + $0x48] ss:$12 sps:$4 sm:$0xff]   ;;  %v757_v33 = vld [vmem:[%s1004_s0 + $0x50] ss:$12 sps:$4 sm:$0xff]  }
   0xc   :  { %614 = vmatprep.subr.bf16.mxu0 %v724_v6  ;;  %705 = vmatprep.subr.bf16.mxu1 %v724_v6  ;;  %v755_v31 = vld [vmem:[%s1004_s0 + $0x38] ss:$12 sps:$4 sm:$0xff]   ;;  %v760_v35 = vld [vmem:[%s1004_s0 + $0x68] ss:$12 sps:$4 sm:$0xff]   ;;  %v761_v36 = vld [vmem:[%s1004_s0 + $0x60] ss:$12 sps:$4 sm:$0xff]  }
   0xd   :  { %v758_v34 = vld [vmem:[%s1004_s0 + $0x64] ss:$12 sps:$4 sm:$0xff]   ;;  %v762_v37 = vld [vmem:[%s1004_s0 + $0x80] ss:$12 sps:$4 sm:$0xff]   ;;  %v763_v38 = vld [vmem:[%s1004_s0 + $0x7c] ss:$12 sps:$4 sm:$0xff]  }
   0xe   :  { %v765_v39 = vld [vmem:[%s1004_s0 + $0x98] ss:$12 sps:$4 sm:$0xff]   ;;  %v767_v41 = vld [vmem:[%s1004_s0 + $0xb0] ss:$12 sps:$4 sm:$0xff]   ;;  %v933_v2 = vld [vmem:[%s1005_s2] ss:$0 sm:$0xff] }
   0xf   :  { %615 = vmatpush3.bf16.msra.mxu0 %v725_v7  ;;  %713 = vmatpush3.bf16.msra.mxu1 %v725_v7  ;;  %v766_v40 = vld [vmem:[%s1004_s0 + $0x78] ss:$12 sps:$4 sm:$0xff]  }
  0x10   :  { %616 = vmatprep.subr.bf16.mxu0 %v726_v8  ;;  %706 = vmatprep.subr.bf16.mxu1 %v726_v8 }
  0x13   :  { %617 = vmatpush3.bf16.msra.mxu0 %v727_v9  ;;  %714 = vmatpush3.bf16.msra.mxu1 %v727_v9 }
  0x14   :  { %618 = vmatprep.subr.bf16.mxu0 %v728_v10  ;;  %707 = vmatprep.subr.bf16.mxu1 %v728_v10 }
  0x17   :  { %619 = vmatpush3.bf16.msra.mxu0 %v729_v13  ;;  %715 = vmatpush3.bf16.msra.mxu1 %v729_v13 }
  0x18   :  { %620 = vmatprep.subr.bf16.mxu0 %v730_v14  ;;  %708 = vmatprep.subr.bf16.mxu1 %v730_v14 }
  0x1b   :  { %621 = vmatpush3.bf16.msra.mxu0 %v731_v15  ;;  %716 = vmatpush3.bf16.msra.mxu1 %v731_v15 }
  0x1c   :  { %622 = vmatprep.subr.bf16.mxu0 %v732_v16  ;;  %709 = vmatprep.subr.bf16.mxu1 %v732_v16 }
  0x1f   :  { %623 = vmatpush3.bf16.msra.mxu0 %v733_v17  ;;  %717 = vmatpush3.bf16.msra.mxu1 %v733_v17 }
  0x20   :  { %682 = vmatprep.subr.bf16.mxu1 %v740_v19 }
  0x22   :  { %376 = vmatmul.mubr.bf16.vlgmr.msra.gmra.mrb[0].mxu0 %v734_v18  ;;  %424 = vmatmul.mubr.bf16.vlgmr.msra.gmra.mrb[0].mxu1 %v737_v20 }
  0x23   :  { %683 = vmatpush3.bf16.msra.mxu1 %v740_v19  ;;  %383 = vmatprep.mubr.bf16.mxu0 %v741_v21 }
  0x24   :  { %431 = vmatprep.mubr.bf16.mxu1 %v743_v22  ;;  %684 = vmatprep.subr.bf16.mxu1 %v747_v23 }
  0x27   :  { %685 = vmatpush3.bf16.msra.mxu1 %v747_v23 }
  0x2a   :  { %384 = vmatmul.mubr.bf16.gmra.mrb[4].mxu0 %v745_v24  ;;  %432 = vmatmul.mubr.bf16.gmra.mrb[4].mxu1 %v746_v25 }
  0x2b   :  { %391 = vmatprep.mubr.bf16.mxu0 %v748_v26  ;;  %686 = vmatprep.mubr.msk.bf16.mxu1 %vm318_vm0, %v750_v27 }
  0x32   :  { %392 = vmatmul.mubr.bf16.gmra.mrb[8].mxu0 %v751_v28  ;;  %687 = vmatmul.mubr.msk.bf16.vlgmr.msra.gmra.mrb[8].mxu1 %vm318_vm0, %v752_v29 }
  0x33   :  { %399 = vmatprep.mubr.bf16.mxu0 %v753_v30  ;;  %690 = vmatprep.mubr.msk.bf16.mxu1 %vm318_vm0, %v755_v31 }
  0x3a   :  { %400 = vmatmul.mubr.bf16.gmra.mrb[12].mxu0 %v756_v32  ;;  %691 = vmatmul.mubr.msk.bf16.gmra.mrb[12].mxu1 %vm318_vm0, %v757_v33 }
  0x3b   :  { %407 = vmatprep.mubr.bf16.mxu0 %v758_v34  ;;  %694 = vmatprep.mubr.msk.bf16.mxu1 %vm318_vm0, %v760_v35 }
  0x42   :  { %408 = vmatmul.mubr.bf16.gmra.mrb[16].mxu0 %v761_v36  ;;  %695 = vmatmul.mubr.msk.bf16.gmra.mrb[16].mxu1 %vm318_vm0, %v762_v37 }
  0x43   :  { %415 = vmatprep.mubr.bf16.mxu0 %v763_v38  ;;  %698 = vmatprep.mubr.msk.bf16.mxu1 %vm318_vm0, %v765_v39 }
  0x4a   :  { %416 = vmatmul.mubr.bf16.gmra.mrb[20].mxu0 %v766_v40  ;;  %699 = vmatmul.mubr.msk.bf16.gmra.mrb[20].mxu1 %vm318_vm0, %v767_v41 }
  0xf5   :  { %v624_v42 = vpop.f32.mrb[0].mxu0  ;;  %v660_v43 = vpop.f32.mrb[0].mxu1 }
  0xf6   :  { %v625_v44 = vpop.f32.mrb[1].mxu0  ;;  %v661_v45 = vpop.f32.mrb[1].mxu1 }
  0xf7   :  { %v626_v46 = vadd.f32 %v625_v44, %v624_v42  ;;  %v627_v47 = vpop.f32.mrb[2].mxu0  ;;  %v922_v48 = vadd.f32 %v661_v45, %v660_v43  ;;  %v663_v49 = vpop.f32.mrb[2].mxu1 }
  0xf8   :  { %v628_v50 = vpop.f32.mrb[3].mxu0  ;;  %v664_v51 = vpop.f32.mrb[3].mxu1 }
  0xf9   :  { %v629_v52 = vadd.f32 %v628_v50, %v627_v47  ;;  %v924_v53 = vadd.f32 %v664_v51, %v663_v49  ;;  %v378_v6 = vadd.f32 %v626_v46, %v933_v2 }
  0xfb   :  { %v381_v15 = vadd.f32 %v629_v52, %v933_v2 }
  0xfd   :  { %v630_v54 = vpop.f32.mrb[4].mxu0  ;;  %v666_v55 = vpop.f32.mrb[4].mxu1 }
  0xfe   :  { %v631_v56 = vpop.f32.mrb[5].mxu0  ;;  %v667_v57 = vpop.f32.mrb[5].mxu1 }
  0xff   :  { %v632_v58 = vadd.f32 %v631_v56, %v630_v54  ;;  %v633_v59 = vpop.f32.mrb[6].mxu0  ;;  %v926_v60 = vadd.f32 %v667_v57, %v666_v55  ;;  %v669_v61 = vpop.f32.mrb[6].mxu1 }
 0x100   :  { %v634_v62 = vpop.f32.mrb[7].mxu0  ;;  %v670_v63 = vpop.f32.mrb[7].mxu1 }
 0x101   :  { %v635_v0 = vadd.f32 %v634_v62, %v633_v59  ;;  %v928_v1 = vadd.f32 %v670_v63, %v669_v61  ;;  %v386_v3 = vadd.f32 %v632_v58, %v933_v2  ;;  %v434_v54 = vadd.f32 %v926_v60, %v933_v2 }
 0x102   :  { %v426_v58 = vadd.f32 %v922_v48, %v933_v2 }
 0x103   :  { %v389_v10 = vadd.f32 %v635_v0, %v933_v2  ;;  %v437_v63 = vadd.f32 %v928_v1, %v933_v2 }
 0x105   :  { %v636_v4 = vpop.f32.mrb[8].mxu0  ;;  %v688_v5 = vpop.f32.mrb[8].mxu1 }
 0x106   :  { %v483_v7 = vadd.f32 %v688_v5, %v386_v3  ;;  %v637_v8 = vpop.f32.mrb[9].mxu0  ;;  %v474_v9 = vpop.f32.mrb[9].mxu1  ;;  %v429_v5 = vadd.f32 %v924_v53, %v933_v2 }
 0x107   :  { %v638_v11 = vadd.f32 %v637_v8, %v636_v4  ;;  %v475_v12 = vadd.f32 %v474_v9, %v378_v6  ;;  %v639_v13 = vpop.f32.mrb[10].mxu0  ;;  %v689_v14 = vpop.f32.mrb[10].mxu1 }
 0x108   :  { %539 = vst [vmem:[%s1006_s3 + $0x10] sm:$0xff] %v483_v7  ;;  %v486_v16 = vadd.f32 %v689_v14, %v389_v10  ;;  %v640_v17 = vpop.f32.mrb[11].mxu0  ;;  %v477_v18 = vpop.f32.mrb[11].mxu1 }
 0x109   :  { %537 = vst [vmem:[%s1006_s3] sm:$0xff] %v475_v12  ;;  %v641_v19 = vadd.f32 %v640_v17, %v639_v13  ;;  %v478_v20 = vadd.f32 %v477_v18, %v381_v15  ;;  %v394_v23 = vadd.f32 %v638_v11, %v933_v2 }
 0x10a   :  { %540 = vst [vmem:[%s1006_s3 + $0x18] sm:$0xff] %v486_v16 }
 0x10b   :  { %538 = vst [vmem:[%s1006_s3 + $0x8] sm:$0xff] %v478_v20  ;;  %v397_v30 = vadd.f32 %v641_v19, %v933_v2 }
 0x10d   :  { %v642_v21 = vpop.f32.mrb[12].mxu0  ;;  %v692_v22 = vpop.f32.mrb[12].mxu1 }
 0x10e   :  { %v643_v24 = vpop.f32.mrb[13].mxu0  ;;  %v490_v25 = vpop.f32.mrb[13].mxu1 }
 0x10f   :  { %v644_v26 = vadd.f32 %v643_v24, %v642_v21  ;;  %v491_v27 = vadd.f32 %v490_v25, %v394_v23  ;;  %v645_v28 = vpop.f32.mrb[14].mxu0  ;;  %v693_v29 = vpop.f32.mrb[14].mxu1 }
 0x110   :  { %v646_v31 = vpop.f32.mrb[15].mxu0  ;;  %v493_v32 = vpop.f32.mrb[15].mxu1 }
 0x111   :  { %v402_v33 = vadd.f32 %v644_v26, %v933_v2  ;;  %541 = vst [vmem:[%s1006_s3 + $0x20] sm:$0xff] %v491_v27  ;;  %v647_v34 = vadd.f32 %v646_v31, %v645_v28  ;;  %v494_v35 = vadd.f32 %v493_v32, %v397_v30 }
 0x113   :  { %v499_v36 = vadd.f32 %v692_v22, %v402_v33  ;;  %v405_v37 = vadd.f32 %v647_v34, %v933_v2  ;;  %542 = vst [vmem:[%s1006_s3 + $0x28] sm:$0xff] %v494_v35 }
 0x115   :  { %543 = vst [vmem:[%s1006_s3 + $0x30] sm:$0xff] %v499_v36  ;;  %v502_v38 = vadd.f32 %v693_v29, %v405_v37  ;;  %v648_v39 = vpop.f32.mrb[16].mxu0  ;;  %v696_v40 = vpop.f32.mrb[16].mxu1 }
 0x116   :  { %v649_v41 = vpop.f32.mrb[17].mxu0  ;;  %v506_v42 = vpop.f32.mrb[17].mxu1 }
 0x117   :  { %544 = vst [vmem:[%s1006_s3 + $0x38] sm:$0xff] %v502_v38  ;;  %v650_v43 = vadd.f32 %v649_v41, %v648_v39  ;;  %v651_v44 = vpop.f32.mrb[18].mxu0  ;;  %v697_v45 = vpop.f32.mrb[18].mxu1 }
 0x118   :  { %v652_v46 = vpop.f32.mrb[19].mxu0  ;;  %v509_v47 = vpop.f32.mrb[19].mxu1 }
 0x119   :  { %v410_v49 = vadd.f32 %v650_v43, %v933_v2  ;;  %v653_v50 = vadd.f32 %v652_v46, %v651_v44 }
 0x11b   :  { %v507_v51 = vadd.f32 %v506_v42, %v410_v49  ;;  %v413_v52 = vadd.f32 %v653_v50, %v933_v2 }
 0x11d   :  { %545 = vst [vmem:[%s1006_s3 + $0x40] sm:$0xff] %v507_v51  ;;  %v510_v55 = vadd.f32 %v509_v47, %v413_v52  ;;  %v654_v56 = vpop.f32.mrb[20].mxu0  ;;  %v700_v57 = vpop.f32.mrb[20].mxu1 }
 0x11e   :  { %v531_v59 = vadd.f32 %v700_v57, %v434_v54  ;;  %v655_v61 = vpop.f32.mrb[21].mxu0  ;;  %v522_v62 = vpop.f32.mrb[21].mxu1 }
 0x11f   :  { %546 = vst [vmem:[%s1006_s3 + $0x48] sm:$0xff] %v510_v55  ;;  %v656_v60 = vadd.f32 %v655_v61, %v654_v56  ;;  %v523_v0 = vadd.f32 %v522_v62, %v426_v58  ;;  %v657_v3 = vpop.f32.mrb[22].mxu0  ;;  %v701_v4 = vpop.f32.mrb[22].mxu1 }
 0x120   :  { %551 = vst [vmem:[%s1006_s3 + $0x70] sm:$0xff] %v531_v59  ;;  %v534_v48 = vadd.f32 %v701_v4, %v437_v63  ;;  %v658_v6 = vpop.f32.mrb[23].mxu0  ;;  %v525_v7 = vpop.f32.mrb[23].mxu1 }
 0x121   :  { %v418_v1 = vadd.f32 %v656_v60, %v933_v2  ;;  %549 = vst [vmem:[%s1006_s3 + $0x60] sm:$0xff] %v523_v0  ;;  %v659_v8 = vadd.f32 %v658_v6, %v657_v3  ;;  %v526_v9 = vadd.f32 %v525_v7, %v429_v5 }
 0x122   :  { %552 = vst [vmem:[%s1006_s3 + $0x78] sm:$0xff] %v534_v48 }
 0x123   :  { %v515_v53 = vadd.f32 %v696_v40, %v418_v1  ;;  %v421_v10 = vadd.f32 %v659_v8, %v933_v2  ;;  %550 = vst [vmem:[%s1006_s3 + $0x68] sm:$0xff] %v526_v9 }
 0x125   :  { %547 = vst [vmem:[%s1006_s3 + $0x50] sm:$0xff] %v515_v53  ;;  %v518_v11 = vadd.f32 %v697_v45, %v421_v10 }
 0x127   :  { %548 = vst [vmem:[%s1006_s3 + $0x58] sm:$0xff] %v518_v11 }

</bundles_post_ra>
